<compile_context>
chip_gen: v5e
topology: v5e:2x2
jax: 0.10.0
libtpu: 0.0.40
codegen_flags: <defaults>
</compile_context>

<pallas_src>
import functools
import math

import jax
import jax.numpy as jnp
from jax.experimental import pallas as pl
from jax.experimental.pallas import tpu as pltpu


def _round_up(x, m):
    return ((x + m - 1) // m) * m


FEATS = [403, 300, 200, 100, 50, 25, 12, 1]
NUM_LAYERS = len(FEATS) - 1                   # 7
N_RELU = 3                                    # layers 0..2: ReLU, 3..5: ReLU6, 6: Sigmoid
PADS = [_round_up(f, 128) for f in FEATS]     # [512, 384, 256, 128, 128, 128, 128, 128]
BN_EPS = 1e-5

# Packed-parameter layout: weights stacked along rows (sublanes), biases along lanes.
W_COLS = max(PADS[1:])                        # 384
W_ROW_OFF = []
_r = 0
for _li in range(NUM_LAYERS):
    W_ROW_OFF.append(_r)
    _r += PADS[_li]
W_ROWS = _r                                   # 1664

B_COL_OFF = []
_c = 0
for _li in range(NUM_LAYERS):
    B_COL_OFF.append(_c)
    _c += PADS[_li + 1]
B_COLS = _c                                   # 1280

# Below this batch size a single grid step has less total overhead than
# splitting; at/above it we force >=2 steps so v7x's two TensorCores both work.
MIN_SPLIT_BATCH = 128


def _lmci_kernel(x_ref, w_ref, b_ref, o_ref):
    """x_ref: (tb, 403) f32/bf16, w_ref: (W_ROWS, W_COLS) bf16 (BN folded),
    b_ref: (1, B_COLS) f32 (BN folded), o_ref: (tb, 1) f32."""
    x = x_ref[...]
    # Build the lane-aligned (tb, 512) first-layer activation directly in bf16:
    # the first dot consumes bf16 anyway, and this halves the widest VMEM
    # intermediate vs padding in f32.
    h = jnp.concatenate(
        [x.astype(jnp.bfloat16),
         jnp.zeros((x.shape[0], PADS[0] - FEATS[0]), jnp.bfloat16)], axis=-1)

    for li in range(NUM_LAYERS):
        kin, kout = PADS[li], PADS[li + 1]
        r0, c0 = W_ROW_OFF[li], B_COL_OFF[li]
        w = w_ref[r0:r0 + kin, 0:kout]          # static (8,128)-aligned slice, bf16
        b = b_ref[0:1, c0:c0 + kout]            # (1, kout) f32
        z = jnp.dot(h.astype(jnp.bfloat16), w,
                    preferred_element_type=jnp.float32) + b
        if li < N_RELU:
            # BN already folded into w/b; dropout is identity in eval mode.
            h = jnp.maximum(z, 0.0)                       # ReLU (f32 epilogue)
        elif li < NUM_LAYERS - 1:
            h = jnp.clip(z, 0.0, 6.0)                     # ReLU6
        else:
            # Only lane 0 of the last layer is real: slice BEFORE the sigmoid
            # and store a single-column block -> no 128-lane padded writeback.
            o_ref[...] = jax.nn.sigmoid(z[:, 0:1]).astype(o_ref.dtype)


def init_raw_params(key):
    """PyTorch-default Linear init plus non-trivial ('trained') BN stats."""
    ws, bs = [], []
    for li in range(NUM_LAYERS):
        fin, fout = FEATS[li], FEATS[li + 1]
        key, k1, k2 = jax.random.split(key, 3)
        bound = 1.0 / math.sqrt(fin)
        ws.append(jax.random.uniform(k1, (fout, fin), jnp.float32, -bound, bound))
        bs.append(jax.random.uniform(k2, (fout,), jnp.float32, -bound, bound))
    nbn = NUM_LAYERS - 1
    key, kg, kb, km, kv = jax.random.split(key, 5)
    return dict(
        w=ws, b=bs,
        gamma=jax.random.uniform(kg, (nbn,), jnp.float32, 0.5, 1.5),
        beta=0.1 * jax.random.normal(kb, (nbn,), jnp.float32),
        mean=0.1 * jax.random.normal(km, (nbn,), jnp.float32),
        var=jax.random.uniform(kv, (nbn,), jnp.float32, 0.5, 1.5),
    )


def pack_params(raw, weight_dtype=jnp.bfloat16):
    """Fold eval-mode BN into the Linears, pad, and pack into 2 arrays."""
    wcat = jnp.zeros((W_ROWS, W_COLS), jnp.float32)
    bcat = jnp.zeros((1, B_COLS), jnp.float32)
    for li in range(NUM_LAYERS):
        fin, fout = FEATS[li], FEATS[li + 1]
        w = raw["w"][li]              # torch layout (out, in)
        b = raw["b"][li]
        if li < NUM_LAYERS - 1:       # a BN(1) follows every Linear except the last
            s = raw["gamma"][li] / jnp.sqrt(raw["var"][li] + BN_EPS)
            t = raw["beta"][li] - s * raw["mean"][li]
            w = s * w
            b = s * b + t
        wcat = wcat.at[W_ROW_OFF[li]:W_ROW_OFF[li] + fin, :fout].set(w.T)
        bcat = bcat.at[0, B_COL_OFF[li]:B_COL_OFF[li] + fout].set(b)
    return dict(w=wcat.astype(weight_dtype), b=bcat)


def _choose_batch_tiling(B, batch_tile, row_align):
    """Ceil-divide first (minimises batch-pad waste), and force >=2 tiles for
    large batches so dimension_semantics=('parallel',) can use both v7x TCs."""
    num_tiles = pl.cdiv(B, batch_tile)
    if B >= MIN_SPLIT_BATCH:
        num_tiles = max(num_tiles, 2)
    tb = _round_up(pl.cdiv(B, num_tiles), row_align)
    return num_tiles, tb


@functools.partial(jax.jit, static_argnames=("batch_tile",))
def lmci_forward(inp, packed, *, batch_tile=1024):
    """inp: (B, 1, 403) float32 (or bfloat16) -> (B, 1, 1) float32 (eval-mode)."""
    B = inp.shape[0]
    x = inp.reshape(B, FEATS[0])
    if x.dtype != jnp.float32 and x.dtype != jnp.bfloat16:
        x = x.astype(jnp.float32)
    # bf16 inputs are consumed directly (kernel casts to bf16 before the first
    # dot anyway), so an upstream bf16 producer halves the dominant HBM read.
    row_align = 16 if x.dtype == jnp.bfloat16 else 8

    num_tiles, tb = _choose_batch_tiling(B, batch_tile, row_align)
    b_pad = num_tiles * tb
    if b_pad != B:
        x = jnp.pad(x, ((0, b_pad - B), (0, 0)))

    out = pl.pallas_call(
        _lmci_kernel,
        out_shape=jax.ShapeDtypeStruct((b_pad, 1), jnp.float32),
        grid_spec=pl.GridSpec(
            grid=(num_tiles,),
            in_specs=[
                pl.BlockSpec((tb, FEATS[0]), lambda i: (i, 0)),    # activations
                # Constant index_map => grid-invariant blocks stay resident in
                # VMEM (no per-step re-DMA of the ~1.25 MB packed weights).
                pl.BlockSpec((W_ROWS, W_COLS), lambda i: (0, 0)),  # packed bf16 weights
                pl.BlockSpec((1, B_COLS), lambda i: (0, 0)),       # packed f32 biases
            ],
            out_specs=pl.BlockSpec((tb, 1), lambda i: (i, 0)),     # single real column
        ),
        compiler_params=pltpu.CompilerParams(
            dimension_semantics=("parallel",),
            vmem_limit_bytes=32 << 20,   # actual need ~8-12 MiB at tb=1024
        ),
    )(x, packed["w"], packed["b"])

    return out[:B].reshape(B, 1, 1)


def _reference_exact(inp, raw):
    """Pure-JAX f32 replica of the PyTorch eval forward (no folding, no bf16)."""
    B = inp.shape[0]
    h = inp.reshape(B, FEATS[0]).astype(jnp.float32)
    for li in range(NUM_LAYERS):
        h = h @ raw["w"][li].T + raw["b"][li]
        if li < NUM_LAYERS - 1:
            s = raw["gamma"][li] / jnp.sqrt(raw["var"][li] + BN_EPS)
            h = s * (h - raw["mean"][li]) + raw["beta"][li]
            h = jnp.maximum(h, 0.0) if li < N_RELU else jnp.clip(h, 0.0, 6.0)
        else:
            h = jax.nn.sigmoid(h)
    return h.reshape(B, 1, 1)


def _reference_packed(inp, packed):
    """Pure-JAX replica of the kernel math (folded + bf16) for a tight check."""
    B = inp.shape[0]
    h = inp.reshape(B, FEATS[0]).astype(jnp.float32)
    h = jnp.concatenate([h, jnp.zeros((B, PADS[0] - FEATS[0]), h.dtype)], axis=-1)
    for li in range(NUM_LAYERS):
        kin, kout = PADS[li], PADS[li + 1]
        w = packed["w"][W_ROW_OFF[li]:W_ROW_OFF[li] + kin, :kout]
        b = packed["b"][0:1, B_COL_OFF[li]:B_COL_OFF[li] + kout]
        h = jnp.dot(h.astype(w.dtype), w, preferred_element_type=jnp.float32) + b
        if li < NUM_LAYERS - 1:
            h = jnp.maximum(h, 0.0) if li < N_RELU else jnp.clip(h, 0.0, 6.0)
        else:
            h = jax.nn.sigmoid(h)
    return h[:, :1].reshape(B, 1, 1)


if __name__ == "__main__":
    key = jax.random.PRNGKey(0)
    pkey, xkey1, xkey2 = jax.random.split(key, 3)

    raw = init_raw_params(pkey)
    packed = pack_params(raw)

    # Small shape consistent with the module: (B, 1, 403). Single grid step.
    inp_small = jax.random.normal(xkey1, (4, 1, 403), jnp.float32)
    out_small = jax.block_until_ready(lmci_forward(inp_small, packed))
    assert out_small.shape == (4, 1, 1), out_small.shape
    assert jnp.allclose(out_small, _reference_packed(inp_small, packed),
                        atol=2e-3, rtol=2e-3)
    # vs. exact f32 torch semantics (loose: bf16 weight/activation quantization).
    assert jnp.allclose(out_small, _reference_exact(inp_small, raw),
                        atol=3e-2, rtol=0.0)

    # Larger batch: exercises the forced 2-tile split (v7x megacore path),
    # ceil-divided tile size (tb=136, b_pad=272) and partial-tile batch padding.
    inp_big = jax.random.normal(xkey2, (260, 1, 403), jnp.float32)
    out_big = jax.block_until_ready(lmci_forward(inp_big, packed))
    assert out_big.shape == (260, 1, 1), out_big.shape
    assert jnp.allclose(out_big, _reference_packed(inp_big, packed),
                        atol=2e-3, rtol=2e-3)

    print("KERNEL_OK")
</pallas_src>

<mosaic_0001>
module attributes {stable_mosaic.version = 11 : i64} {
  func.func @_lmci_kernel(%arg0: i32, %arg1: memref<8x403xf32, #tpu.memory_space<vmem>>, %arg2: memref<1664x384xbf16, #tpu.memory_space<vmem>>, %arg3: memref<1x1280xf32, #tpu.memory_space<vmem>>, %arg4: memref<8x1xf32, #tpu.memory_space<vmem>>) attributes {dimension_semantics = [#tpu.dimension_semantics<parallel>], iteration_bounds = array<i64: 1>, scalar_prefetch = 0 : i64, scratch_operands = 0 : i64, tpu.core_type = #tpu.core_type<tc>, window_params = [{transform_indices = @transform_0, window_bounds = array<i64: 8, 403>}, {pipeline_mode = #tpu.pipeline_mode<synchronous>, transform_indices = @transform_1, window_bounds = array<i64: 1664, 384>}, {pipeline_mode = #tpu.pipeline_mode<synchronous>, transform_indices = @transform_2, window_bounds = array<i64: 1, 1280>}, {transform_indices = @transform_3, window_bounds = array<i64: 8, 1>}]} {
    %c0 = arith.constant 0 : index
    %c0_0 = arith.constant 0 : index
    %0 = vector.load %arg1[%c0, %c0_0] : memref<8x403xf32, #tpu.memory_space<vmem>>, vector<8x403xf32>
    %1 = arith.truncf %0 : vector<8x403xf32> to vector<8x403xbf16>
    %cst = arith.constant 0.000000e+00 : bf16
    %2 = vector.broadcast %cst : bf16 to vector<8x109xbf16>
    %3 = tpu.concatenate %1, %2 in 1 : vector<8x403xbf16>, vector<8x109xbf16> -> vector<8x512xbf16>
    %c0_1 = arith.constant 0 : index
    %c0_2 = arith.constant 0 : index
    %4 = vector.load %arg2[%c0_1, %c0_2] : memref<1664x384xbf16, #tpu.memory_space<vmem>>, vector<512x384xbf16>
    %c0_3 = arith.constant 0 : index
    %c0_4 = arith.constant 0 : index
    %5 = vector.load %arg3[%c0_3, %c0_4] : memref<1x1280xf32, #tpu.memory_space<vmem>>, vector<1x384xf32>
    %cst_5 = arith.constant dense<0.000000e+00> : vector<8x384xf32>
    %6 = tpu.matmul %3, %4, %cst_5 {dimension_numbers = #tpu.dot_dimension_numbers<[1], [0], [0], [1], [0, 0, 1, 1], [], []>} : vector<8x512xbf16>, vector<512x384xbf16>, vector<8x384xf32> -> vector<8x384xf32>
    %7 = vector.broadcast %5 : vector<1x384xf32> to vector<8x384xf32>
    %8 = arith.addf %6, %7 : vector<8x384xf32>
    %cst_6 = arith.constant 0.000000e+00 : f32
    %9 = vector.broadcast %cst_6 : f32 to vector<8x384xf32>
    %10 = arith.maximumf %8, %9 : vector<8x384xf32>
    %c512 = arith.constant 512 : index
    %c0_7 = arith.constant 0 : index
    %11 = vector.load %arg2[%c512, %c0_7] : memref<1664x384xbf16, #tpu.memory_space<vmem>>, vector<384x256xbf16>
    %c0_8 = arith.constant 0 : index
    %c384 = arith.constant 384 : index
    %12 = vector.load %arg3[%c0_8, %c384] : memref<1x1280xf32, #tpu.memory_space<vmem>>, vector<1x256xf32>
    %13 = arith.truncf %10 : vector<8x384xf32> to vector<8x384xbf16>
    %cst_9 = arith.constant dense<0.000000e+00> : vector<8x256xf32>
    %14 = tpu.matmul %13, %11, %cst_9 {dimension_numbers = #tpu.dot_dimension_numbers<[1], [0], [0], [1], [0, 0, 1, 1], [], []>} : vector<8x384xbf16>, vector<384x256xbf16>, vector<8x256xf32> -> vector<8x256xf32>
    %15 = vector.broadcast %12 : vector<1x256xf32> to vector<8x256xf32>
    %16 = arith.addf %14, %15 : vector<8x256xf32>
    %cst_10 = arith.constant 0.000000e+00 : f32
    %17 = vector.broadcast %cst_10 : f32 to vector<8x256xf32>
    %18 = arith.maximumf %16, %17 : vector<8x256xf32>
    %c896 = arith.constant 896 : index
    %c0_11 = arith.constant 0 : index
    %19 = vector.load %arg2[%c896, %c0_11] : memref<1664x384xbf16, #tpu.memory_space<vmem>>, vector<256x128xbf16>
    %c0_12 = arith.constant 0 : index
    %c640 = arith.constant 640 : index
    %20 = vector.load %arg3[%c0_12, %c640] : memref<1x1280xf32, #tpu.memory_space<vmem>>, vector<1x128xf32>
    %21 = arith.truncf %18 : vector<8x256xf32> to vector<8x256xbf16>
    %cst_13 = arith.constant dense<0.000000e+00> : vector<8x128xf32>
    %22 = tpu.matmul %21, %19, %cst_13 {dimension_numbers = #tpu.dot_dimension_numbers<[1], [0], [0], [1], [0, 0, 1, 1], [], []>} : vector<8x256xbf16>, vector<256x128xbf16>, vector<8x128xf32> -> vector<8x128xf32>
    %23 = vector.broadcast %20 : vector<1x128xf32> to vector<8x128xf32>
    %24 = arith.addf %22, %23 : vector<8x128xf32>
    %cst_14 = arith.constant 0.000000e+00 : f32
    %25 = vector.broadcast %cst_14 : f32 to vector<8x128xf32>
    %26 = arith.maximumf %24, %25 : vector<8x128xf32>
    %c1152 = arith.constant 1152 : index
    %c0_15 = arith.constant 0 : index
    %27 = vector.load %arg2[%c1152, %c0_15] : memref<1664x384xbf16, #tpu.memory_space<vmem>>, vector<128x128xbf16>
    %c0_16 = arith.constant 0 : index
    %c768 = arith.constant 768 : index
    %28 = vector.load %arg3[%c0_16, %c768] : memref<1x1280xf32, #tpu.memory_space<vmem>>, vector<1x128xf32>
    %29 = arith.truncf %26 : vector<8x128xf32> to vector<8x128xbf16>
    %cst_17 = arith.constant dense<0.000000e+00> : vector<8x128xf32>
    %30 = tpu.matmul %29, %27, %cst_17 {dimension_numbers = #tpu.dot_dimension_numbers<[1], [0], [0], [1], [0, 0, 1, 1], [], []>} : vector<8x128xbf16>, vector<128x128xbf16>, vector<8x128xf32> -> vector<8x128xf32>
    %31 = vector.broadcast %28 : vector<1x128xf32> to vector<8x128xf32>
    %32 = arith.addf %30, %31 : vector<8x128xf32>
    %cst_18 = arith.constant 0.000000e+00 : f32
    %cst_19 = arith.constant 6.000000e+00 : f32
    %33 = vector.broadcast %cst_18 : f32 to vector<8x128xf32>
    %34 = arith.maximumf %33, %32 : vector<8x128xf32>
    %35 = vector.broadcast %cst_19 : f32 to vector<8x128xf32>
    %36 = arith.minimumf %35, %34 : vector<8x128xf32>
    %c1280 = arith.constant 1280 : index
    %c0_20 = arith.constant 0 : index
    %37 = vector.load %arg2[%c1280, %c0_20] : memref<1664x384xbf16, #tpu.memory_space<vmem>>, vector<128x128xbf16>
    %c0_21 = arith.constant 0 : index
    %c896_22 = arith.constant 896 : index
    %38 = vector.load %arg3[%c0_21, %c896_22] : memref<1x1280xf32, #tpu.memory_space<vmem>>, vector<1x128xf32>
    %39 = arith.truncf %36 : vector<8x128xf32> to vector<8x128xbf16>
    %cst_23 = arith.constant dense<0.000000e+00> : vector<8x128xf32>
    %40 = tpu.matmul %39, %37, %cst_23 {dimension_numbers = #tpu.dot_dimension_numbers<[1], [0], [0], [1], [0, 0, 1, 1], [], []>} : vector<8x128xbf16>, vector<128x128xbf16>, vector<8x128xf32> -> vector<8x128xf32>
    %41 = vector.broadcast %38 : vector<1x128xf32> to vector<8x128xf32>
    %42 = arith.addf %40, %41 : vector<8x128xf32>
    %cst_24 = arith.constant 0.000000e+00 : f32
    %cst_25 = arith.constant 6.000000e+00 : f32
    %43 = vector.broadcast %cst_24 : f32 to vector<8x128xf32>
    %44 = arith.maximumf %43, %42 : vector<8x128xf32>
    %45 = vector.broadcast %cst_25 : f32 to vector<8x128xf32>
    %46 = arith.minimumf %45, %44 : vector<8x128xf32>
    %c1408 = arith.constant 1408 : index
    %c0_26 = arith.constant 0 : index
    %47 = vector.load %arg2[%c1408, %c0_26] : memref<1664x384xbf16, #tpu.memory_space<vmem>>, vector<128x128xbf16>
    %c0_27 = arith.constant 0 : index
    %c1024 = arith.constant 1024 : index
    %48 = vector.load %arg3[%c0_27, %c1024] : memref<1x1280xf32, #tpu.memory_space<vmem>>, vector<1x128xf32>
    %49 = arith.truncf %46 : vector<8x128xf32> to vector<8x128xbf16>
    %cst_28 = arith.constant dense<0.000000e+00> : vector<8x128xf32>
    %50 = tpu.matmul %49, %47, %cst_28 {dimension_numbers = #tpu.dot_dimension_numbers<[1], [0], [0], [1], [0, 0, 1, 1], [], []>} : vector<8x128xbf16>, vector<128x128xbf16>, vector<8x128xf32> -> vector<8x128xf32>
    %51 = vector.broadcast %48 : vector<1x128xf32> to vector<8x128xf32>
    %52 = arith.addf %50, %51 : vector<8x128xf32>
    %cst_29 = arith.constant 0.000000e+00 : f32
    %cst_30 = arith.constant 6.000000e+00 : f32
    %53 = vector.broadcast %cst_29 : f32 to vector<8x128xf32>
    %54 = arith.maximumf %53, %52 : vector<8x128xf32>
    %55 = vector.broadcast %cst_30 : f32 to vector<8x128xf32>
    %56 = arith.minimumf %55, %54 : vector<8x128xf32>
    %c1536 = arith.constant 1536 : index
    %c0_31 = arith.constant 0 : index
    %57 = vector.load %arg2[%c1536, %c0_31] : memref<1664x384xbf16, #tpu.memory_space<vmem>>, vector<128x128xbf16>
    %c0_32 = arith.constant 0 : index
    %c1152_33 = arith.constant 1152 : index
    %58 = vector.load %arg3[%c0_32, %c1152_33] : memref<1x1280xf32, #tpu.memory_space<vmem>>, vector<1x128xf32>
    %59 = arith.truncf %56 : vector<8x128xf32> to vector<8x128xbf16>
    %cst_34 = arith.constant dense<0.000000e+00> : vector<8x128xf32>
    %60 = tpu.matmul %59, %57, %cst_34 {dimension_numbers = #tpu.dot_dimension_numbers<[1], [0], [0], [1], [0, 0, 1, 1], [], []>} : vector<8x128xbf16>, vector<128x128xbf16>, vector<8x128xf32> -> vector<8x128xf32>
    %61 = vector.broadcast %58 : vector<1x128xf32> to vector<8x128xf32>
    %62 = arith.addf %60, %61 : vector<8x128xf32>
    %63 = vector.extract_strided_slice %62 {offsets = [0, 0], sizes = [8, 1], strides = [1, 1]} : vector<8x128xf32> to vector<8x1xf32>
    %64 = arith.negf %63 : vector<8x1xf32>
    %65 = math.exp %64 : vector<8x1xf32>
    %cst_35 = arith.constant 1.000000e+00 : f32
    %66 = vector.broadcast %cst_35 : f32 to vector<8x1xf32>
    %67 = arith.addf %66, %65 : vector<8x1xf32>
    %68 = arith.divf %66, %67 : vector<8x1xf32>
    %c0_36 = arith.constant 0 : index
    %c0_37 = arith.constant 0 : index
    %69 = vector.load %arg4[%c0_36, %c0_37] : memref<8x1xf32, #tpu.memory_space<vmem>>, vector<8x1xf32>
    tpu.vector_store %arg4[%c0_36, %c0_37], %68 {strides = array<i32>} : memref<8x1xf32, #tpu.memory_space<vmem>>, vector<8x1xf32>,
    return
  }
  func.func @transform_0(%arg0: i32) -> (i32, i32) {
    %c0_i32 = arith.constant 0 : i32
    %c0_i32_0 = arith.constant 0 : i32
    return %arg0, %c0_i32 : i32, i32
  }
  func.func @transform_1(%arg0: i32) -> (i32, i32) {
    %c0_i32 = arith.constant 0 : i32
    %c0_i32_0 = arith.constant 0 : i32
    %c0_i32_1 = arith.constant 0 : i32
    return %c0_i32, %c0_i32_0 : i32, i32
  }
  func.func @transform_2(%arg0: i32) -> (i32, i32) {
    %c0_i32 = arith.constant 0 : i32
    %c0_i32_0 = arith.constant 0 : i32
    %c0_i32_1 = arith.constant 0 : i32
    return %c0_i32, %c0_i32_0 : i32, i32
  }
  func.func @transform_3(%arg0: i32) -> (i32, i32) {
    %c0_i32 = arith.constant 0 : i32
    %c0_i32_0 = arith.constant 0 : i32
    return %arg0, %c0_i32 : i32, i32
  }
}

</mosaic_0001>

<bundles_post_ra>
// kernel: lmci_forward.1
= control target key start
LH: loop header
LB: loop body
LE: loop exit
PB: predicated region body
PF: predicated region fallthrough
CT: control target
= control target key end

     0   :  { %8 = vsyncpa [#allocation3], 0  ;;  %s2880_s0 = inlined_call_operand.vmem [shape: f32[8,403], index: 0, kind: input, shape index: {}]   ;;  %s2881_s1 = inlined_call_operand.hbm [shape: bf16[1664,384], index: 1, kind: input, shape index: {}]   ;;  %s2882_s2 = inlined_call_operand.hbm [shape: f32[1,1280], index: 2, kind: input, shape index: {}]   ;;  %s2883_s3 = inlined_call_operand.vmem [shape: f32[8,1], index: 3, kind: output, shape index: {}]  }
   0x1   :  { %s16_s14 = sshll.u32 %s2881_s1, 4  ;;  %s17_s14 = int_to_ptr.hbm [resolvable:$true] %s16_s14 }
   0x2   :  { %9 = vsyncpa [#allocation5], 0  ;;  %s2804_s15 = smov [#allocation2]   ;;  %s30_s19 = sshll.u32 %s2882_s2, 4  ;;  %s31_s19 = int_to_ptr.hbm [resolvable:$true] %s30_s19 }
   0x3   :  { %s18_s16 = sshll.u32 %s2804_s15, 4  ;;  %s2805_s20 = smov 192   ;;  %s19_s16 = int_to_ptr.vmem [resolvable:$true] %s18_s16 }
   0x4   :  { %s2806_s21 = smov 12   ;;  %s2807_s22 = smov [#allocation4]  }
   0x5   :  { %24 = dma.hbm_to_vmem [thread:$0]  %s17_s14, 39936, %s19_s16, [#allocation3], %s2805_s20, %s2805_s20, %s2806_s21  }
   0x6   :  { %s32_s23 = sshll.u32 %s2807_s22, 4  ;;  %s33_s23 = int_to_ptr.vmem [resolvable:$true] %s32_s23 }
   0x7   :  { %35 = dma.hbm_to_vmem [thread:$0]  %s31_s19, 160, %s33_s23, [#allocation5]  }
   0x8   :  { %2800 = dma.done.wait [#allocation3], 39936  }
   0x9   :  { %2801 = vsyncadd [#allocation3], 4294927360 }
   0xa   :  { %2802 = dma.done.wait [#allocation5], 160  }
   0xb   :  { %2803 = vsyncadd [#allocation5], 4294967136  ;;  %v1861_v0 = vld [vmem:[#allocation2 + $0xa8] sm:$0xf]  ;;  %v2569_v1 = vld [vmem:[#allocation2 + $0xb0] sm:$0xf0] }
   0xc   :  { %v1957_v2 = vld [vmem:[#allocation2 + $0x168] sm:$0xf]  ;;  %v1862_v3 = vor.u32 %v2569_v1, %v1861_v0  ;;  %v2593_v4 = vld [vmem:[#allocation2 + $0x170] sm:$0xf0]  ;;  %v1849_v11 = vld [vmem:[#allocation2 + $0x90] sm:$0xf] }
   0xd   :  { %v2053_v5 = vld [vmem:[#allocation2 + $0x228] sm:$0xf]  ;;  %v2617_v6 = vld [vmem:[#allocation2 + $0x230] sm:$0xf0]  ;;  %v1958_v7 = vor.u32 %v2593_v4, %v1957_v2  ;;  %v2566_v13 = vld [vmem:[#allocation2 + $0x98] sm:$0xf0] }
   0xe   :  { %v2054_v8 = vor.u32 %v2617_v6, %v2053_v5  ;;  %v2149_v9 = vld [vmem:[#allocation2 + $0x2e8] sm:$0xf]  ;;  %v2641_v10 = vld [vmem:[#allocation2 + $0x2f0] sm:$0xf0]  ;;  %717 = vmatpush.bf16.msra.mxu0 %v1862_v3  ;;  %v1945_v14 = vld [vmem:[#allocation2 + $0x150] sm:$0xf]  ;;  %v1850_v16 = vor.u32 %v2566_v13, %v1849_v11 }
   0xf   :  { %v2150_v12 = vor.u32 %v2641_v10, %v2149_v9  ;;  %v2590_v15 = vld [vmem:[#allocation2 + $0x158] sm:$0xf0]  ;;  %730 = vmatpush.bf16.msra.mxu1 %v1958_v7  ;;  %v2041_v18 = vld [vmem:[#allocation2 + $0x210] sm:$0xf]  ;;  %v1837_v23 = vld [vmem:[#allocation2 + $0x78] sm:$0xf] }
  0x10   :  { %743 = vmatpush.bf16.msra.mxu2 %v2054_v8  ;;  %v1946_v17 = vor.u32 %v2590_v15, %v1945_v14  ;;  %v2614_v19 = vld [vmem:[#allocation2 + $0x218] sm:$0xf0]  ;;  %v2137_v20 = vld [vmem:[#allocation2 + $0x2d0] sm:$0xf]  ;;  %v2563_v24 = vld [vmem:[#allocation2 + $0x80] sm:$0xf0] }
  0x11   :  { %756 = vmatpush.bf16.msra.mxu3 %v2150_v12  ;;  %v2042_v21 = vor.u32 %v2614_v19, %v2041_v18  ;;  %v2638_v22 = vld [vmem:[#allocation2 + $0x2d8] sm:$0xf0]  ;;  %v1933_v26 = vld [vmem:[#allocation2 + $0x138] sm:$0xf]  ;;  %v2587_v27 = vld [vmem:[#allocation2 + $0x140] sm:$0xf0]  ;;  %v1838_v29 = vor.u32 %v2563_v24, %v1837_v23 }
  0x12   :  { %v2138_v25 = vor.u32 %v2638_v22, %v2137_v20  ;;  %v2029_v28 = vld [vmem:[#allocation2 + $0x1f8] sm:$0xf]  ;;  %718 = vmatpush.bf16.msra.mxu0 %v1850_v16  ;;  %v2611_v30 = vld [vmem:[#allocation2 + $0x200] sm:$0xf0]  ;;  %v1934_v33 = vor.u32 %v2587_v27, %v1933_v26  ;;  %v1825_v35 = vld [vmem:[#allocation2 + $0x60] sm:$0xf] }
  0x13   :  { %v2125_v31 = vld [vmem:[#allocation2 + $0x2b8] sm:$0xf]  ;;  %v2635_v32 = vld [vmem:[#allocation2 + $0x2c0] sm:$0xf0]  ;;  %731 = vmatpush.bf16.msra.mxu1 %v1946_v17  ;;  %v2030_v34 = vor.u32 %v2611_v30, %v2029_v28  ;;  %v2560_v36 = vld [vmem:[#allocation2 + $0x68] sm:$0xf0] }
  0x14   :  { %744 = vmatpush.bf16.msra.mxu2 %v2042_v21  ;;  %v1921_v37 = vld [vmem:[#allocation2 + $0x120] sm:$0xf]  ;;  %v2126_v38 = vor.u32 %v2635_v32, %v2125_v31  ;;  %v2584_v39 = vld [vmem:[#allocation2 + $0x128] sm:$0xf0]  ;;  %v1826_v44 = vor.u32 %v2560_v36, %v1825_v35  ;;  %v1813_v47 = vld [vmem:[#allocation2 + $0x48] sm:$0xf] }
  0x15   :  { %757 = vmatpush.bf16.msra.mxu3 %v2138_v25  ;;  %v2017_v40 = vld [vmem:[#allocation2 + $0x1e0] sm:$0xf]  ;;  %v2608_v41 = vld [vmem:[#allocation2 + $0x1e8] sm:$0xf0]  ;;  %v1922_v45 = vor.u32 %v2584_v39, %v1921_v37  ;;  %v2557_v48 = vld [vmem:[#allocation2 + $0x50] sm:$0xf0] }
  0x16   :  { %v2113_v42 = vld [vmem:[#allocation2 + $0x2a0] sm:$0xf]  ;;  %v2632_v43 = vld [vmem:[#allocation2 + $0x2a8] sm:$0xf0]  ;;  %719 = vmatpush.bf16.msra.mxu0 %v1838_v29  ;;  %v2018_v46 = vor.u32 %v2608_v41, %v2017_v40  ;;  %v1909_v49 = vld [vmem:[#allocation2 + $0x108] sm:$0xf]  ;;  %v1814_v56 = vor.u32 %v2557_v48, %v1813_v47 }
  0x17   :  { %732 = vmatpush.bf16.msra.mxu1 %v1934_v33  ;;  %v2114_v50 = vor.u32 %v2632_v43, %v2113_v42  ;;  %v2581_v51 = vld [vmem:[#allocation2 + $0x110] sm:$0xf0]  ;;  %v2005_v52 = vld [vmem:[#allocation2 + $0x1c8] sm:$0xf]  ;;  %v1801_v59 = vld [vmem:[#allocation2 + $0x30] sm:$0xf] }
  0x18   :  { %745 = vmatpush.bf16.msra.mxu2 %v2030_v34  ;;  %v2605_v53 = vld [vmem:[#allocation2 + $0x1d0] sm:$0xf0]  ;;  %v2101_v54 = vld [vmem:[#allocation2 + $0x288] sm:$0xf]  ;;  %v1910_v57 = vor.u32 %v2581_v51, %v1909_v49  ;;  %v2554_v60 = vld [vmem:[#allocation2 + $0x38] sm:$0xf0] }
  0x19   :  { %758 = vmatpush.bf16.msra.mxu3 %v2126_v38  ;;  %v2629_v55 = vld [vmem:[#allocation2 + $0x290] sm:$0xf0]  ;;  %v2006_v58 = vor.u32 %v2605_v53, %v2005_v52  ;;  %v1897_v61 = vld [vmem:[#allocation2 + $0xf0] sm:$0xf]  ;;  %v2578_v63 = vld [vmem:[#allocation2 + $0xf8] sm:$0xf0]  ;;  %v1802_v4 = vor.u32 %v2554_v60, %v1801_v59 }
  0x1a   :  { %720 = vmatpush.bf16.msra.mxu0 %v1826_v44  ;;  %v2102_v62 = vor.u32 %v2629_v55, %v2101_v54  ;;  %v1993_v0 = vld [vmem:[#allocation2 + $0x1b0] sm:$0xf]  ;;  %v2602_v1 = vld [vmem:[#allocation2 + $0x1b8] sm:$0xf0]  ;;  %v1898_v5 = vor.u32 %v2578_v63, %v1897_v61  ;;  %v1789_v7 = vld [vmem:[#allocation2 + $0x18] sm:$0xf] }
  0x1b   :  { %733 = vmatpush.bf16.msra.mxu1 %v1922_v45  ;;  %v2089_v2 = vld [vmem:[#allocation2 + $0x270] sm:$0xf]  ;;  %v2626_v3 = vld [vmem:[#allocation2 + $0x278] sm:$0xf0]  ;;  %v1994_v6 = vor.u32 %v2602_v1, %v1993_v0  ;;  %v2551_v8 = vld [vmem:[#allocation2 + $0x20] sm:$0xf0] }
  0x1c   :  { %746 = vmatpush.bf16.msra.mxu2 %v2018_v46  ;;  %v1885_v9 = vld [vmem:[#allocation2 + $0xd8] sm:$0xf]  ;;  %v2090_v10 = vor.u32 %v2626_v3, %v2089_v2  ;;  %v2575_v11 = vld [vmem:[#allocation2 + $0xe0] sm:$0xf0]  ;;  %v1790_v16 = vor.u32 %v2551_v8, %v1789_v7  ;;  %v1777_v17 = vld [vmem:[#allocation2] sm:$0xf] }
  0x1d   :  { %759 = vmatpush.bf16.msra.mxu3 %v2114_v50  ;;  %v1981_v12 = vld [vmem:[#allocation2 + $0x198] sm:$0xf]  ;;  %v2599_v13 = vld [vmem:[#allocation2 + $0x1a0] sm:$0xf0]  ;;  %v2548_v18 = vld [vmem:[#allocation2 + $0x8] sm:$0xf0]  ;;  %v1886_v19 = vor.u32 %v2575_v11, %v1885_v9 }
  0x1e   :  { %721 = vmatpush.bf16.msra.mxu0 %v1814_v56  ;;  %v2077_v14 = vld [vmem:[#allocation2 + $0x258] sm:$0xf]  ;;  %v2623_v15 = vld [vmem:[#allocation2 + $0x260] sm:$0xf0]  ;;  %v1982_v20 = vor.u32 %v2599_v13, %v1981_v12  ;;  %v1873_v21 = vld [vmem:[#allocation2 + $0xc0] sm:$0xf]  ;;  %v1778_v31 = vor.u32 %v2548_v18, %v1777_v17 }
  0x1f   :  { %734 = vmatpush.bf16.msra.mxu1 %v1910_v57  ;;  %v2572_v22 = vld [vmem:[#allocation2 + $0xc8] sm:$0xf0]  ;;  %v1969_v23 = vld [vmem:[#allocation2 + $0x180] sm:$0xf]  ;;  %v2078_v24 = vor.u32 %v2623_v15, %v2077_v14  ;;  %v1863_v29 = vld [vmem:[#allocation2 + $0xb4] sm:$0xf0] }
  0x20   :  { %747 = vmatpush.bf16.msra.mxu2 %v2006_v58  ;;  %v2596_v25 = vld [vmem:[#allocation2 + $0x188] sm:$0xf0]  ;;  %v2065_v26 = vld [vmem:[#allocation2 + $0x240] sm:$0xf]  ;;  %v1959_v32 = vld [vmem:[#allocation2 + $0x174] sm:$0xf0]  ;;  %v1874_v35 = vor.u32 %v2572_v22, %v1873_v21 }
  0x21   :  { %760 = vmatpush.bf16.msra.mxu3 %v2102_v62  ;;  %v2620_v27 = vld [vmem:[#allocation2 + $0x248] sm:$0xf0]  ;;  %v2055_v34 = vld [vmem:[#allocation2 + $0x234] sm:$0xf0]  ;;  %v1970_v36 = vor.u32 %v2596_v25, %v1969_v23  ;;  %v2565_v41 = vld [vmem:[#allocation2 + $0x94] sm:$0xf] }
  0x22   :  { %722 = vmatpush.bf16.msra.mxu0 %v1802_v4  ;;  %v2568_v28 = vld [vmem:[#allocation2 + $0xac] sm:$0xf]  ;;  %v2151_v38 = vld [vmem:[#allocation2 + $0x2f4] sm:$0xf0]  ;;  %v2066_v39 = vor.u32 %v2620_v27, %v2065_v26  ;;  %v1851_v44 = vld [vmem:[#allocation2 + $0x9c] sm:$0xf0] }
  0x23   :  { %735 = vmatpush.bf16.msra.mxu1 %v1898_v5  ;;  %v2592_v30 = vld [vmem:[#allocation2 + $0x16c] sm:$0xf]  ;;  %v1866_v40 = vor.u32 %v2568_v28, %v1863_v29  ;;  %v2589_v45 = vld [vmem:[#allocation2 + $0x154] sm:$0xf]  ;;  %v1947_v46 = vld [vmem:[#allocation2 + $0x15c] sm:$0xf0]  ;;  %v1854_v54 = vor.u32 %v2565_v41, %v1851_v44 }
  0x24   :  { %748 = vmatpush.bf16.msra.mxu2 %v1994_v6  ;;  %v2616_v33 = vld [vmem:[#allocation2 + $0x22c] sm:$0xf]  ;;  %v1962_v42 = vor.u32 %v2592_v30, %v1959_v32  ;;  %v2613_v48 = vld [vmem:[#allocation2 + $0x214] sm:$0xf]  ;;  %v2043_v49 = vld [vmem:[#allocation2 + $0x21c] sm:$0xf0]  ;;  %v1950_v58 = vor.u32 %v2589_v45, %v1947_v46 }
  0x25   :  { %761 = vmatpush.bf16.msra.mxu3 %v2090_v10  ;;  %v2640_v37 = vld [vmem:[#allocation2 + $0x2ec] sm:$0xf]  ;;  %v2058_v43 = vor.u32 %v2616_v33, %v2055_v34  ;;  %v2637_v50 = vld [vmem:[#allocation2 + $0x2d4] sm:$0xf]  ;;  %v2139_v51 = vld [vmem:[#allocation2 + $0x2dc] sm:$0xf0]  ;;  %v2046_v59 = vor.u32 %v2613_v48, %v2043_v49 }
  0x26   :  { %723 = vmatpush.bf16.msra.mxu0 %v1790_v16  ;;  %v2154_v47 = vor.u32 %v2640_v37, %v2151_v38  ;;  %v47_v52 = vld [vmem:[%s2880_s0 + $0x10] sm:$0xff]  ;;  %v48_v53 = vld [vmem:[%s2880_s0 + $0x18] sm:$0xff]  ;;  %v1839_v56 = vld [vmem:[#allocation2 + $0x84] sm:$0xf0]  ;;  %v2142_v63 = vor.u32 %v2637_v50, %v2139_v51  ;;  %vm64_vm0 = vcmask 154624   ;;  %vm1767_vm4 = vcmask 7168  }
  0x27   :  { %736 = vmatpush.bf16.msra.mxu1 %v1886_v19  ;;  %v2562_v55 = vld [vmem:[#allocation2 + $0x7c] sm:$0xf]  ;;  %v50_v57 = vpack.c.bf16 %v48_v53, %v47_v52  ;;  %v1935_v61 = vld [vmem:[#allocation2 + $0x144] sm:$0xf0]  ;;  %v45_v2 = vld [vmem:[%s2880_s0] sm:$0xff] }
  0x28   :  { %749 = vmatpush.bf16.msra.mxu2 %v1982_v20  ;;  %v2586_v60 = vld [vmem:[#allocation2 + $0x13c] sm:$0xf]  ;;  %v2031_v0 = vld [vmem:[#allocation2 + $0x204] sm:$0xf0]  ;;  %v1842_v8 = vor.u32 %v2562_v55, %v1839_v56  ;;  %v2559_v13 = vld [vmem:[#allocation2 + $0x64] sm:$0xf] }
  0x29   :  { %762 = vmatpush.bf16.msra.mxu3 %v2078_v24  ;;  %v2610_v62 = vld [vmem:[#allocation2 + $0x1fc] sm:$0xf]  ;;  %v55_v1 = vunpack.c.l.b16 %v50_v57  ;;  %v46_v3 = vld [vmem:[%s2880_s0 + $0x8] sm:$0xff]  ;;  %v56_v4 = vunpack.c.h.b16 %v50_v57  ;;  %v1938_v11 = vor.u32 %v2586_v60, %v1935_v61  ;;  %v1827_v14 = vld [vmem:[#allocation2 + $0x6c] sm:$0xf0] }
  0x2a   :  { %724 = vmatpush.bf16.msra.mxu0 %v1778_v31  ;;  %v2634_v5 = vld [vmem:[#allocation2 + $0x2bc] sm:$0xf]  ;;  %v2127_v6 = vld [vmem:[#allocation2 + $0x2c4] sm:$0xf0]  ;;  %v49_v7 = vpack.c.bf16 %v46_v3, %v45_v2  ;;  %v2034_v12 = vor.u32 %v2610_v62, %v2031_v0  ;;  %v2583_v15 = vld [vmem:[#allocation2 + $0x124] sm:$0xf]  ;;  %v1830_v26 = vor.u32 %v2559_v13, %v1827_v14 }
  0x2b   :  { %737 = vmatpush.bf16.msra.mxu1 %v1874_v35  ;;  %v2846_v9 = vpack.c.b16 %v55_v1, %v55_v1  ;;  %v2848_v10 = vpack.c.b16 %v56_v4, %v56_v4  ;;  %v2130_v18 = vor.u32 %v2634_v5, %v2127_v6  ;;  %v1923_v19 = vld [vmem:[#allocation2 + $0x12c] sm:$0xf0]  ;;  %v2607_v20 = vld [vmem:[#allocation2 + $0x1e4] sm:$0xf]  ;;  %v2556_v29 = vld [vmem:[#allocation2 + $0x4c] sm:$0xf] }
  0x2c   :  { %750 = vmatpush.bf16.msra.mxu2 %v1970_v36  ;;  %v53_v16 = vunpack.c.l.b16 %v49_v7  ;;  %v54_v17 = vunpack.c.h.b16 %v49_v7  ;;  %v2019_v21 = vld [vmem:[#allocation2 + $0x1ec] sm:$0xf0]  ;;  %v2631_v22 = vld [vmem:[#allocation2 + $0x2a4] sm:$0xf]  ;;  %v1926_v27 = vor.u32 %v2583_v15, %v1923_v19  ;;  %v1815_v30 = vld [vmem:[#allocation2 + $0x54] sm:$0xf0] }
  0x2d   :  { %763 = vmatpush.bf16.msra.mxu3 %v2066_v39  ;;  %v2115_v23 = vld [vmem:[#allocation2 + $0x2ac] sm:$0xf0]  ;;  %v2022_v28 = vor.u32 %v2607_v20, %v2019_v21  ;;  %v2580_v31 = vld [vmem:[#allocation2 + $0x10c] sm:$0xf]  ;;  %v1911_v33 = vld [vmem:[#allocation2 + $0x114] sm:$0xf0]  ;;  %v1818_v38 = vor.u32 %v2556_v29, %v1815_v30 }
  0x2e   :  { %769 = vmatpush.bf16.msrb.mxu0 %v1866_v40  ;;  %v2851_v24 = vpack.c.b16 %v53_v16, %v53_v16  ;;  %v2855_v25 = vpack.c.b16 %v54_v17, %v54_v17  ;;  %v2118_v32 = vor.u32 %v2631_v22, %v2115_v23  ;;  %v2604_v34 = vld [vmem:[#allocation2 + $0x1cc] sm:$0xf]  ;;  %v2007_v35 = vld [vmem:[#allocation2 + $0x1d4] sm:$0xf0]  ;;  %v1914_v39 = vor.u32 %v2580_v31, %v1911_v33  ;;  %v2553_v41 = vld [vmem:[#allocation2 + $0x34] sm:$0xf] }
  0x2f   :  { %782 = vmatpush.bf16.msrb.mxu1 %v1962_v42  ;;  %751 = vmatmul.bf16.vlgmr.msra.gmra.mxu2 %v2846_v9  ;;  %v2628_v36 = vld [vmem:[#allocation2 + $0x28c] sm:$0xf]  ;;  %v2103_v37 = vld [vmem:[#allocation2 + $0x294] sm:$0xf0]  ;;  %v2010_v40 = vor.u32 %v2604_v34, %v2007_v35  ;;  %v1803_v42 = vld [vmem:[#allocation2 + $0x3c] sm:$0xf0] }
  0x30   :  { %795 = vmatpush.bf16.msrb.mxu2 %v2058_v43  ;;  %2159 = vmatmul.msk.bf16.vlgmr.msra.gmra.mxu3 %vm64_vm0, %v2848_v10  ;;  %v2577_v43 = vld [vmem:[#allocation2 + $0xf4] sm:$0xf]  ;;  %v2106_v44 = vor.u32 %v2628_v36, %v2103_v37  ;;  %v1899_v45 = vld [vmem:[#allocation2 + $0xfc] sm:$0xf0]  ;;  %v1806_v50 = vor.u32 %v2553_v41, %v1803_v42  ;;  %v2550_v53 = vld [vmem:[#allocation2 + $0x1c] sm:$0xf] }
  0x31   :  { %808 = vmatpush.bf16.msrb.mxu3 %v2154_v47  ;;  %725 = vmatmul.bf16.vlgmr.msra.gmra.mxu0 %v2851_v24  ;;  %v2601_v46 = vld [vmem:[#allocation2 + $0x1b4] sm:$0xf]  ;;  %v1995_v47 = vld [vmem:[#allocation2 + $0x1bc] sm:$0xf0]  ;;  %v1902_v51 = vor.u32 %v2577_v43, %v1899_v45  ;;  %v2574_v55 = vld [vmem:[#allocation2 + $0xdc] sm:$0xf] }
  0x32   :  { %770 = vmatpush.bf16.msrb.mxu0 %v1854_v54  ;;  %738 = vmatmul.bf16.vlgmr.msra.gmra.mxu1 %v2855_v25  ;;  %v2625_v48 = vld [vmem:[#allocation2 + $0x274] sm:$0xf]  ;;  %v2091_v49 = vld [vmem:[#allocation2 + $0x27c] sm:$0xf0]  ;;  %v1998_v52 = vor.u32 %v2601_v46, %v1995_v47  ;;  %v1791_v54 = vld [vmem:[#allocation2 + $0x24] sm:$0xf0] }
  0x33   :  { %783 = vmatpush.bf16.msrb.mxu1 %v1950_v58  ;;  %v2094_v56 = vor.u32 %v2625_v48, %v2091_v49  ;;  %v1887_v57 = vld [vmem:[#allocation2 + $0xe4] sm:$0xf0]  ;;  %v2598_v58 = vld [vmem:[#allocation2 + $0x19c] sm:$0xf]  ;;  %v1794_v62 = vor.u32 %v2550_v53, %v1791_v54  ;;  %v1779_v0 = vld [vmem:[#allocation2 + $0xc] sm:$0xf0] }
  0x34   :  { %796 = vmatpush.bf16.msrb.mxu2 %v2046_v59  ;;  %v1983_v59 = vld [vmem:[#allocation2 + $0x1a4] sm:$0xf0]  ;;  %v2622_v60 = vld [vmem:[#allocation2 + $0x25c] sm:$0xf]  ;;  %v1890_v1 = vor.u32 %v2574_v55, %v1887_v57  ;;  %v2571_v3 = vld [vmem:[#allocation2 + $0xc4] sm:$0xf] }
  0x35   :  { %809 = vmatpush.bf16.msrb.mxu3 %v2142_v63  ;;  %v2079_v61 = vld [vmem:[#allocation2 + $0x264] sm:$0xf0]  ;;  %v2547_v63 = vld [vmem:[#allocation2 + $0x4] sm:$0xf]  ;;  %v1986_v2 = vor.u32 %v2598_v58, %v1983_v59  ;;  %v1875_v4 = vld [vmem:[#allocation2 + $0xcc] sm:$0xf0] }
  0x36   :  { %771 = vmatpush.bf16.msrb.mxu0 %v1842_v8  ;;  %v2595_v5 = vld [vmem:[#allocation2 + $0x184] sm:$0xf]  ;;  %v2082_v6 = vor.u32 %v2622_v60, %v2079_v61  ;;  %v1971_v7 = vld [vmem:[#allocation2 + $0x18c] sm:$0xf0]  ;;  %v2570_v13 = vld [vmem:[#allocation2 + $0xb8] sm:$0xf0]  ;;  %v1782_v15 = vor.u32 %v2547_v63, %v1779_v0  ;;  %v1878_v19 = vor.u32 %v2571_v3, %v1875_v4 }
  0x37   :  { %784 = vmatpush.bf16.msrb.mxu1 %v1938_v11  ;;  %v2619_v8 = vld [vmem:[#allocation2 + $0x244] sm:$0xf]  ;;  %v2067_v11 = vld [vmem:[#allocation2 + $0x24c] sm:$0xf0]  ;;  %v2594_v16 = vld [vmem:[#allocation2 + $0x178] sm:$0xf0]  ;;  %v1974_v20 = vor.u32 %v2595_v5, %v1971_v7 }
  0x38   :  { %797 = vmatpush.bf16.msrb.mxu2 %v2034_v12  ;;  %v1869_v12 = vld [vmem:[#allocation2 + $0xb0] sm:$0xf]  ;;  %v2642_v22 = vld [vmem:[#allocation2 + $0x2f8] sm:$0xf0]  ;;  %v2070_v23 = vor.u32 %v2619_v8, %v2067_v11  ;;  %v1857_v29 = vld [vmem:[#allocation2 + $0x98] sm:$0xf] }
  0x39   :  { %810 = vmatpush.bf16.msrb.mxu3 %v2130_v18  ;;  %v1965_v14 = vld [vmem:[#allocation2 + $0x170] sm:$0xf]  ;;  %v2618_v18 = vld [vmem:[#allocation2 + $0x238] sm:$0xf0]  ;;  %v2567_v30 = vld [vmem:[#allocation2 + $0xa0] sm:$0xf0] }
  0x3a   :  { %772 = vmatpush.bf16.msrb.mxu0 %v1830_v26  ;;  %v2061_v17 = vld [vmem:[#allocation2 + $0x230] sm:$0xf]  ;;  %v1870_v26 = vor.u32 %v2570_v13, %v1869_v12  ;;  %v1953_v31 = vld [vmem:[#allocation2 + $0x158] sm:$0xf]  ;;  %v2591_v33 = vld [vmem:[#allocation2 + $0x160] sm:$0xf0] }
  0x3b   :  { %785 = vmatpush.bf16.msrb.mxu1 %v1926_v27  ;;  %v2157_v21 = vld [vmem:[#allocation2 + $0x2f0] sm:$0xf]  ;;  %v1966_v27 = vor.u32 %v2594_v16, %v1965_v14  ;;  %v2049_v34 = vld [vmem:[#allocation2 + $0x218] sm:$0xf]  ;;  %v2615_v35 = vld [vmem:[#allocation2 + $0x220] sm:$0xf0] }
  0x3c   :  { %798 = vmatpush.bf16.msrb.mxu2 %v2022_v28  ;;  %v2062_v28 = vor.u32 %v2618_v18, %v2061_v17  ;;  %v2145_v36 = vld [vmem:[#allocation2 + $0x2d8] sm:$0xf]  ;;  %v2639_v37 = vld [vmem:[#allocation2 + $0x2e0] sm:$0xf0]  ;;  %v2050_v41 = vor.u32 %v2615_v35, %v2049_v34  ;;  %v2564_v42 = vld [vmem:[#allocation2 + $0x88] sm:$0xf0] }
  0x3d   :  { %811 = vmatpush.bf16.msrb.mxu3 %v2118_v32  ;;  %v2158_v32 = vor.u32 %v2642_v22, %v2157_v21  ;;  %v1941_v43 = vld [vmem:[#allocation2 + $0x140] sm:$0xf]  ;;  %v2146_v45 = vor.u32 %v2639_v37, %v2145_v36  ;;  %v2612_v47 = vld [vmem:[#allocation2 + $0x208] sm:$0xf0]  ;;  %v1929_v53 = vld [vmem:[#allocation2 + $0x128] sm:$0xf] }
  0x3e   :  { %773 = vmatpush.bf16.msrb.mxu0 %v1818_v38  ;;  %v1858_v38 = vor.u32 %v2567_v30, %v1857_v29  ;;  %v2037_v46 = vld [vmem:[#allocation2 + $0x200] sm:$0xf]  ;;  %v2636_v49 = vld [vmem:[#allocation2 + $0x2c8] sm:$0xf0]  ;;  %v2585_v57 = vld [vmem:[#allocation2 + $0x130] sm:$0xf0] }
  0x3f   :  { %786 = vmatpush.bf16.msrb.mxu1 %v1914_v39  ;;  %v1845_v39 = vld [vmem:[#allocation2 + $0x80] sm:$0xf]  ;;  %v2038_v55 = vor.u32 %v2612_v47, %v2037_v46  ;;  %v2025_v58 = vld [vmem:[#allocation2 + $0x1e8] sm:$0xf]  ;;  %v2609_v59 = vld [vmem:[#allocation2 + $0x1f0] sm:$0xf0]  ;;  %v1930_v63 = vor.u32 %v2585_v57, %v1929_v53 }
  0x40   :  { %799 = vmatpush.bf16.msrb.mxu2 %v2010_v40  ;;  %v1954_v40 = vor.u32 %v2591_v33, %v1953_v31  ;;  %v2133_v48 = vld [vmem:[#allocation2 + $0x2c0] sm:$0xf]  ;;  %v2121_v60 = vld [vmem:[#allocation2 + $0x2a8] sm:$0xf]  ;;  %v2633_v61 = vld [vmem:[#allocation2 + $0x2b0] sm:$0xf0]  ;;  %v2026_v0 = vor.u32 %v2609_v59, %v2025_v58 }
  0x41   :  { %812 = vmatpush.bf16.msrb.mxu3 %v2106_v44  ;;  %v2588_v44 = vld [vmem:[#allocation2 + $0x148] sm:$0xf0]  ;;  %v1917_v3 = vld [vmem:[#allocation2 + $0x110] sm:$0xf]  ;;  %v2122_v4 = vor.u32 %v2633_v61, %v2121_v60  ;;  %v2582_v5 = vld [vmem:[#allocation2 + $0x118] sm:$0xf0] }
  0x42   :  { %774 = vmatpush.bf16.msrb.mxu0 %v1806_v50  ;;  %v1833_v50 = vld [vmem:[#allocation2 + $0x68] sm:$0xf]  ;;  %v1942_v54 = vor.u32 %v2588_v44, %v1941_v43  ;;  %v2606_v7 = vld [vmem:[#allocation2 + $0x1d8] sm:$0xf0]  ;;  %v2109_v8 = vld [vmem:[#allocation2 + $0x290] sm:$0xf]  ;;  %v1918_v13 = vor.u32 %v2582_v5, %v1917_v3 }
  0x43   :  { %787 = vmatpush.bf16.msrb.mxu1 %v1902_v51  ;;  %v2561_v51 = vld [vmem:[#allocation2 + $0x70] sm:$0xf0]  ;;  %v2630_v11 = vld [vmem:[#allocation2 + $0x298] sm:$0xf0]  ;;  %v2555_v16 = vld [vmem:[#allocation2 + $0x40] sm:$0xf0] }
  0x44   :  { %800 = vmatpush.bf16.msrb.mxu2 %v1998_v52  ;;  %v1846_v52 = vor.u32 %v2564_v42, %v1845_v39  ;;  %v1905_v17 = vld [vmem:[#allocation2 + $0xf8] sm:$0xf]  ;;  %v2110_v18 = vor.u32 %v2630_v11, %v2109_v8  ;;  %v2603_v21 = vld [vmem:[#allocation2 + $0x1c0] sm:$0xf0]  ;;  %v1797_v29 = vld [vmem:[#allocation2 + $0x20] sm:$0xf] }
  0x45   :  { %813 = vmatpush.bf16.msrb.mxu3 %v2094_v56  ;;  %v2134_v56 = vor.u32 %v2636_v49, %v2133_v48  ;;  %v2097_v22 = vld [vmem:[#allocation2 + $0x278] sm:$0xf]  ;;  %v2552_v30 = vld [vmem:[#allocation2 + $0x28] sm:$0xf0]  ;;  %v1893_v31 = vld [vmem:[#allocation2 + $0xe0] sm:$0xf] }
  0x46   :  { %775 = vmatpush.bf16.msrb.mxu0 %v1794_v62  ;;  %v1834_v62 = vor.u32 %v2561_v51, %v1833_v50  ;;  %v2576_v33 = vld [vmem:[#allocation2 + $0xe8] sm:$0xf0]  ;;  %v1989_v34 = vld [vmem:[#allocation2 + $0x1a0] sm:$0xf]  ;;  %v1785_v39 = vld [vmem:[#allocation2 + $0x8] sm:$0xf] }
  0x47   :  { %788 = vmatpush.bf16.msrb.mxu1 %v1890_v1  ;;  %v1821_v1 = vld [vmem:[#allocation2 + $0x50] sm:$0xf]  ;;  %v2600_v35 = vld [vmem:[#allocation2 + $0x1a8] sm:$0xf0]  ;;  %v2085_v36 = vld [vmem:[#allocation2 + $0x260] sm:$0xf] }
  0x48   :  { %801 = vmatpush.bf16.msrb.mxu2 %v1986_v2  ;;  %v2558_v2 = vld [vmem:[#allocation2 + $0x58] sm:$0xf0]  ;;  %v2624_v37 = vld [vmem:[#allocation2 + $0x268] sm:$0xf0]  ;;  %v2549_v42 = vld [vmem:[#allocation2 + $0x10] sm:$0xf0] }
  0x49   :  { %814 = vmatpush.bf16.msrb.mxu3 %v2082_v6  ;;  %v2013_v6 = vld [vmem:[#allocation2 + $0x1d0] sm:$0xf]  ;;  %v1822_v12 = vor.u32 %v2558_v2, %v1821_v1  ;;  %v1881_v43 = vld [vmem:[#allocation2 + $0xc8] sm:$0xf]  ;;  %v2573_v44 = vld [vmem:[#allocation2 + $0xd0] sm:$0xf0] }
  0x4a   :  { %776 = vmatpush.bf16.msrb.mxu0 %v1782_v15  ;;  %v2014_v14 = vor.u32 %v2606_v7, %v2013_v6  ;;  %v1809_v15 = vld [vmem:[#allocation2 + $0x38] sm:$0xf]  ;;  %v1977_v46 = vld [vmem:[#allocation2 + $0x188] sm:$0xf]  ;;  %v2597_v47 = vld [vmem:[#allocation2 + $0x190] sm:$0xf0] }
  0x4b   :  { %789 = vmatpush.bf16.msrb.mxu1 %v1878_v19  ;;  %v2579_v19 = vld [vmem:[#allocation2 + $0x100] sm:$0xf0]  ;;  %v2073_v48 = vld [vmem:[#allocation2 + $0x248] sm:$0xf]  ;;  %v2621_v49 = vld [vmem:[#allocation2 + $0x250] sm:$0xf0] }
  0x4c   :  { %802 = vmatpush.bf16.msrb.mxu2 %v1974_v20  ;;  %v2001_v20 = vld [vmem:[#allocation2 + $0x1b8] sm:$0xf]  ;;  %v2220_v50 = vld [vmem:[#allocation2 + $0x3a8] sm:$0xf]  ;;  %v2658_v51 = vld [vmem:[#allocation2 + $0x3b0] sm:$0xf0]  ;;  %v2074_v57 = vor.u32 %v2621_v49, %v2073_v48 }
  0x4d   :  { %815 = vmatpush.bf16.msrb.mxu3 %v2070_v23  ;;  %777 = vmatmul.bf16.vlgmr.msrb.gmra.mxu0 %v2851_v24  ;;  %v2627_v23 = vld [vmem:[#allocation2 + $0x280] sm:$0xf0]  ;;  %v2657_v53 = vld [vmem:[#allocation2 + $0x3ac] sm:$0xf]  ;;  %v2221_v58 = vor.u32 %v2658_v51, %v2220_v50  ;;  %v2284_v59 = vld [vmem:[#allocation2 + $0x468] sm:$0xf] }
  0x4e   :  { %821 = vmatpush.bf16.msra.mxu0 %v1870_v26  ;;  %790 = vmatmul.bf16.vlgmr.msrb.gmra.mxu1 %v2855_v25  ;;  %v1810_v26 = vor.u32 %v2555_v16, %v1809_v15  ;;  %v2674_v60 = vld [vmem:[#allocation2 + $0x470] sm:$0xf0]  ;;  %v2212_v61 = vld [vmem:[#allocation2 + $0x390] sm:$0xf]  ;;  %v2214_v1 = vld [vmem:[#allocation2 + $0x39c] sm:$0xf0] }
  0x4f   :  { %834 = vmatpush.bf16.msra.mxu1 %v1966_v27  ;;  %803 = vmatmul.bf16.vlgmr.msrb.gmra.mxu2 %v2846_v9  ;;  %v1906_v27 = vor.u32 %v2579_v19, %v1905_v17  ;;  %v2285_v2 = vor.u32 %v2674_v60, %v2284_v59  ;;  %v2654_v5 = vld [vmem:[#allocation2 + $0x380] sm:$0xf0]  ;;  %v2653_v7 = vld [vmem:[#allocation2 + $0x37c] sm:$0xf]  ;;  %v2206_v8 = vld [vmem:[#allocation2 + $0x384] sm:$0xf0] }
  0x50   :  { %847 = vmatpush.bf16.msra.mxu2 %v2062_v28  ;;  %2160 = vmatmul.msk.bf16.vlgmr.msrb.gmra.mxu3 %vm64_vm0, %v2848_v10  ;;  %v2002_v28 = vor.u32 %v2603_v21, %v2001_v20  ;;  %v2198_v15 = vld [vmem:[#allocation2 + $0x36c] sm:$0xf0]  ;;  %v2188_v17 = vld [vmem:[#allocation2 + $0x348] sm:$0xf]  ;;  %v2648_v20 = vld [vmem:[#allocation2 + $0x338] sm:$0xf0] }
  0x51   :  { %860 = vmatpush.bf16.msra.mxu3 %v2158_v32  ;;  %v2098_v32 = vor.u32 %v2627_v23, %v2097_v22  ;;  %v2180_v19 = vld [vmem:[#allocation2 + $0x330] sm:$0xf]  ;;  %v2172_v21 = vld [vmem:[#allocation2 + $0x318] sm:$0xf]  ;;  %v2646_v22 = vld [vmem:[#allocation2 + $0x320] sm:$0xf0] }
  0x52   :  { %822 = vmatpush.bf16.msra.mxu0 %v1858_v38  ;;  %v1798_v38 = vor.u32 %v2552_v30, %v1797_v29  ;;  %v2173_v23 = vor.u32 %v2646_v22, %v2172_v21  ;;  %v2672_v30 = vld [vmem:[#allocation2 + $0x458] sm:$0xf0]  ;;  %v2668_v48 = vld [vmem:[#allocation2 + $0x428] sm:$0xf0]  ;;  %v2174_v51 = vld [vmem:[#allocation2 + $0x324] sm:$0xf0] }
  0x53   :  { %835 = vmatpush.bf16.msra.mxu1 %v1954_v40  ;;  %v1894_v40 = vor.u32 %v2576_v33, %v1893_v31  ;;  %v2649_v31 = vld [vmem:[#allocation2 + $0x34c] sm:$0xf]  ;;  %v2645_v49 = vld [vmem:[#allocation2 + $0x31c] sm:$0xf]  ;;  %v2166_v59 = vld [vmem:[#allocation2 + $0x30c] sm:$0xf0] }
  0x54   :  { %848 = vmatpush.bf16.msra.mxu2 %v2050_v41  ;;  %v1990_v41 = vor.u32 %v2600_v35, %v1989_v34  ;;  %v2673_v35 = vld [vmem:[#allocation2 + $0x46c] sm:$0xf]  ;;  %v2667_v60 = vld [vmem:[#allocation2 + $0x424] sm:$0xf]  ;;  %v2690_v21 = vld [vmem:[#allocation2 + $0x530] sm:$0xf0] }
  0x55   :  { %861 = vmatpush.bf16.msra.mxu3 %v2146_v45  ;;  %v2086_v45 = vor.u32 %v2624_v37, %v2085_v36  ;;  %v2286_v36 = vld [vmem:[#allocation2 + $0x474] sm:$0xf0]  ;;  %v2661_v22 = vld [vmem:[#allocation2 + $0x3dc] sm:$0xf] }
  0x56   :  { %823 = vmatpush.bf16.msra.mxu0 %v1846_v52  ;;  %v1786_v52 = vor.u32 %v2549_v42, %v1785_v39  ;;  %v2289_v37 = vor.u32 %v2673_v35, %v2286_v36  ;;  %v2670_v39 = vld [vmem:[#allocation2 + $0x440] sm:$0xf0]  ;;  %v2182_v42 = vld [vmem:[#allocation2 + $0x33c] sm:$0xf0]  ;;  %v2688_v35 = vld [vmem:[#allocation2 + $0x518] sm:$0xf0] }
  0x57   :  { %836 = vmatpush.bf16.msra.mxu1 %v1942_v54  ;;  %v2222_v54 = vld [vmem:[#allocation2 + $0x3b4] sm:$0xf0]  ;;  %v2659_v36 = vld [vmem:[#allocation2 + $0x3c4] sm:$0xf] }
  0x58   :  { %849 = vmatpush.bf16.msra.mxu2 %v2038_v55  ;;  %v1882_v55 = vor.u32 %v2573_v44, %v1881_v43  ;;  %v2671_v43 = vld [vmem:[#allocation2 + $0x454] sm:$0xf]  ;;  %v2278_v44 = vld [vmem:[#allocation2 + $0x45c] sm:$0xf0] }
  0x59   :  { %862 = vmatpush.bf16.msra.mxu3 %v2134_v56  ;;  %v1978_v56 = vor.u32 %v2597_v47, %v1977_v46  ;;  %v2281_v46 = vor.u32 %v2671_v43, %v2278_v44  ;;  %v2260_v47 = vld [vmem:[#allocation2 + $0x420] sm:$0xf]  ;;  %v2332_v44 = vld [vmem:[#allocation2 + $0x4f8] sm:$0xf] }
  0x5a   :  { %824 = vmatpush.bf16.msra.mxu0 %v1834_v62  ;;  %v2656_v62 = vld [vmem:[#allocation2 + $0x398] sm:$0xf0]  ;;  %v2261_v50 = vor.u32 %v2668_v48, %v2260_v47  ;;  %v2334_v48 = vld [vmem:[#allocation2 + $0x504] sm:$0xf0] }
  0x5b   :  { %837 = vmatpush.bf16.msra.mxu1 %v1930_v63  ;;  %v2225_v63 = vor.u32 %v2657_v53, %v2222_v54  ;;  %v2213_v3 = vor.u32 %v2656_v62, %v2212_v61  ;;  %v2270_v53 = vld [vmem:[#allocation2 + $0x444] sm:$0xf0]  ;;  %v2177_v54 = vor.u32 %v2645_v49, %v2174_v51  ;;  %v2262_v61 = vld [vmem:[#allocation2 + $0x42c] sm:$0xf0] }
  0x5c   :  { %850 = vmatpush.bf16.msra.mxu2 %v2026_v0  ;;  %v2655_v0 = vld [vmem:[#allocation2 + $0x394] sm:$0xf] }
  0x5d   :  { %863 = vmatpush.bf16.msra.mxu3 %v2122_v4  ;;  %v2204_v4 = vld [vmem:[#allocation2 + $0x378] sm:$0xf]  ;;  %v2217_v6 = vor.u32 %v2655_v0, %v2214_v1  ;;  %v2265_v0 = vor.u32 %v2667_v60, %v2262_v61  ;;  %v2244_v1 = vld [vmem:[#allocation2 + $0x3f0] sm:$0xf] }
  0x5e   :  { %825 = vmatpush.bf16.msra.mxu0 %v1822_v12  ;;  %v2205_v11 = vor.u32 %v2654_v5, %v2204_v4  ;;  %v2196_v12 = vld [vmem:[#allocation2 + $0x360] sm:$0xf]  ;;  %v2665_v5 = vld [vmem:[#allocation2 + $0x40c] sm:$0xf] }
  0x5f   :  { %838 = vmatpush.bf16.msra.mxu1 %v1918_v13  ;;  %v2652_v13 = vld [vmem:[#allocation2 + $0x368] sm:$0xf0] }
  0x60   :  { %851 = vmatpush.bf16.msra.mxu2 %v2014_v14  ;;  %v2651_v14 = vld [vmem:[#allocation2 + $0x364] sm:$0xf]  ;;  %v2197_v16 = vor.u32 %v2652_v13, %v2196_v12 }
  0x61   :  { %864 = vmatpush.bf16.msra.mxu3 %v2110_v18  ;;  %v2662_v12 = vld [vmem:[#allocation2 + $0x3e0] sm:$0xf0] }
  0x62   :  { %826 = vmatpush.bf16.msra.mxu0 %v1810_v26  ;;  %v2164_v26 = vld [vmem:[#allocation2 + $0x300] sm:$0xf] }
  0x63   :  { %839 = vmatpush.bf16.msra.mxu1 %v1906_v27  ;;  %v2644_v27 = vld [vmem:[#allocation2 + $0x308] sm:$0xf0] }
  0x64   :  { %852 = vmatpush.bf16.msra.mxu2 %v2002_v28  ;;  %v2276_v28 = vld [vmem:[#allocation2 + $0x450] sm:$0xf]  ;;  %v2165_v29 = vor.u32 %v2644_v27, %v2164_v26 }
  0x65   :  { %865 = vmatpush.bf16.msra.mxu3 %v2098_v32  ;;  %v2190_v32 = vld [vmem:[#allocation2 + $0x354] sm:$0xf0]  ;;  %v2277_v33 = vor.u32 %v2672_v30, %v2276_v28  ;;  %v2238_v28 = vld [vmem:[#allocation2 + $0x3e4] sm:$0xf0] }
  0x66   :  { %827 = vmatpush.bf16.msra.mxu0 %v1798_v38  ;;  %v2193_v34 = vor.u32 %v2649_v31, %v2190_v32  ;;  %v2268_v38 = vld [vmem:[#allocation2 + $0x438] sm:$0xf]  ;;  %v2241_v31 = vor.u32 %v2661_v22, %v2238_v28 }
  0x67   :  { %840 = vmatpush.bf16.msra.mxu1 %v1894_v40  ;;  %v2647_v40 = vld [vmem:[#allocation2 + $0x334] sm:$0xf]  ;;  %v2350_v30 = vld [vmem:[#allocation2 + $0x534] sm:$0xf0] }
  0x68   :  { %853 = vmatpush.bf16.msra.mxu2 %v1990_v41  ;;  %v2269_v41 = vor.u32 %v2670_v39, %v2268_v38  ;;  %v2230_v38 = vld [vmem:[#allocation2 + $0x3cc] sm:$0xf0]  ;;  %v2687_v39 = vld [vmem:[#allocation2 + $0x514] sm:$0xf] }
  0x69   :  { %866 = vmatpush.bf16.msra.mxu3 %v2086_v45  ;;  %v2185_v45 = vor.u32 %v2647_v40, %v2182_v42  ;;  %v2342_v40 = vld [vmem:[#allocation2 + $0x51c] sm:$0xf0]  ;;  %v2233_v42 = vor.u32 %v2659_v36, %v2230_v38 }
  0x6a   :  { %828 = vmatpush.bf16.msra.mxu0 %v1786_v52  ;;  %v2669_v52 = vld [vmem:[#allocation2 + $0x43c] sm:$0xf]  ;;  %v2345_v43 = vor.u32 %v2687_v39, %v2342_v40 }
  0x6b   :  { %841 = vmatpush.bf16.msra.mxu1 %v1882_v55  ;;  %v2273_v55 = vor.u32 %v2669_v52, %v2270_v53 }
  0x6c   :  { %854 = vmatpush.bf16.msra.mxu2 %v1978_v56  ;;  %v2252_v56 = vld [vmem:[#allocation2 + $0x408] sm:$0xf] }
  0x6d   :  { %867 = vmatpush.bf16.msra.mxu3 %v2074_v57  ;;  %829 = vmatmul.bf16.vlgmr.msra.gmra.mxu0 %v2851_v24  ;;  %v2209_v24 = vor.u32 %v2653_v7, %v2206_v8  ;;  %v2666_v57 = vld [vmem:[#allocation2 + $0x410] sm:$0xf0] }
  0x6e   :  { %1173 = vmatpush.bf16.msrb.mxu0 %v2221_v58  ;;  %842 = vmatmul.bf16.vlgmr.msra.gmra.mxu1 %v2855_v25  ;;  %v2650_v25 = vld [vmem:[#allocation2 + $0x350] sm:$0xf0]  ;;  %v2643_v58 = vld [vmem:[#allocation2 + $0x304] sm:$0xf]  ;;  %v2253_v62 = vor.u32 %v2666_v57, %v2252_v56  ;;  %v2684_v57 = vld [vmem:[#allocation2 + $0x4e8] sm:$0xf0] }
  0x6f   :  { %855 = vmatmul.bf16.vlgmr.msra.gmra.mxu2 %v2846_v9  ;;  %1186 = vmatpush.bf16.msrb.mxu1 %v2285_v2  ;;  %v2201_v9 = vor.u32 %v2651_v14, %v2198_v15  ;;  %v2189_v18 = vor.u32 %v2650_v25, %v2188_v17  ;;  %v2664_v2 = vld [vmem:[#allocation2 + $0x3f8] sm:$0xf0]  ;;  %v2246_v14 = vld [vmem:[#allocation2 + $0x3fc] sm:$0xf0] }
  0x70   :  { %2161 = vmatmul.msk.bf16.vlgmr.msra.gmra.mxu3 %vm64_vm0, %v2848_v10  ;;  %v2181_v10 = vor.u32 %v2648_v20, %v2180_v19  ;;  %v2245_v4 = vor.u32 %v2664_v2, %v2244_v1  ;;  %v2318_v2 = vld [vmem:[#allocation2 + $0x4d4] sm:$0xf0] }
  0x71   :  { %1212 = vmatpush.bf16.msrb.mxu3 %v2225_v63  ;;  %v2169_v63 = vor.u32 %v2643_v58, %v2166_v59  ;;  %v2683_v58 = vld [vmem:[#allocation2 + $0x4e4] sm:$0xf]  ;;  %v2326_v59 = vld [vmem:[#allocation2 + $0x4ec] sm:$0xf0] }
  0x72   :  { %1174 = vmatpush.bf16.msrb.mxu0 %v2213_v3  ;;  %v2869_v3 = vld [vmem:[#allocation4] sm:$0x7]  ;;  %v2329_v61 = vor.u32 %v2683_v58, %v2326_v59  ;;  %v2698_v58 = vld [vmem:[#allocation2 + $0x5f0] sm:$0xf0] }
  0x73   :  { %1187 = vmatpush.bf16.msrb.mxu1 %v2277_v33  ;;  %v199_v8 = vperm.slane %v2869_v3, 0  ;;  %v201_v38 = vperm.slane %v2869_v3, 2 }
  0x75   :  { %1213 = vmatpush.bf16.msrb.mxu3 %v2217_v6  ;;  %v2254_v6 = vld [vmem:[#allocation2 + $0x414] sm:$0xf0] }
  0x76   :  { %1175 = vmatpush.bf16.msrb.mxu0 %v2205_v11  ;;  %v2257_v7 = vor.u32 %v2665_v5, %v2254_v6  ;;  %v2236_v11 = vld [vmem:[#allocation2 + $0x3d8] sm:$0xf]  ;;  %v2308_v6 = vld [vmem:[#allocation2 + $0x4b0] sm:$0xf] }
  0x77   :  { %1188 = vmatpush.bf16.msrb.mxu1 %v2269_v41  ;;  %v2237_v13 = vor.u32 %v2662_v12, %v2236_v11 }
  0x79   :  { %1214 = vmatpush.bf16.msrb.mxu3 %v2209_v24  ;;  %v2663_v24 = vld [vmem:[#allocation2 + $0x3f4] sm:$0xf] }
  0x7a   :  { %1176 = vmatpush.bf16.msrb.mxu0 %v2197_v16  ;;  %v2249_v15 = vor.u32 %v2663_v24, %v2246_v14 }
  0x7b   :  { %1189 = vmatpush.bf16.msrb.mxu1 %v2261_v50 }
  0x7d   :  { %1215 = vmatpush.bf16.msrb.mxu3 %v2201_v9  ;;  %v2228_v9 = vld [vmem:[#allocation2 + $0x3c0] sm:$0xf] }
  0x7e   :  { %1177 = vmatpush.bf16.msrb.mxu0 %v2189_v18  ;;  %v2660_v18 = vld [vmem:[#allocation2 + $0x3c8] sm:$0xf0] }
  0x7f   :  { %1190 = vmatpush.bf16.msrb.mxu1 %v2253_v62  ;;  %v2229_v20 = vor.u32 %v2660_v18, %v2228_v9  ;;  %v2316_v62 = vld [vmem:[#allocation2 + $0x4c8] sm:$0xf]  ;;  %v2677_v9 = vld [vmem:[#allocation2 + $0x49c] sm:$0xf] }
  0x81   :  { %1216 = vmatpush.bf16.msrb.mxu3 %v2193_v34  ;;  %v2340_v34 = vld [vmem:[#allocation2 + $0x510] sm:$0xf] }
  0x82   :  { %1178 = vmatpush.bf16.msrb.mxu0 %v2181_v10  ;;  %v2348_v10 = vld [vmem:[#allocation2 + $0x528] sm:$0xf] }
  0x83   :  { %1191 = vmatpush.bf16.msrb.mxu1 %v2245_v4  ;;  %v2349_v27 = vor.u32 %v2690_v21, %v2348_v10  ;;  %v200_v4 = vperm.slane %v2869_v3, 1 }
  0x85   :  { %1217 = vmatpush.bf16.msrb.mxu3 %v2185_v45  ;;  %1199 = vmatpush.bf16.msrb.mxu2 %v2349_v27  ;;  %v2686_v45 = vld [vmem:[#allocation2 + $0x500] sm:$0xf0] }
  0x86   :  { %1179 = vmatpush.bf16.msrb.mxu0 %v2173_v23  ;;  %v2333_v52 = vor.u32 %v2686_v45, %v2332_v44  ;;  %v2675_v27 = vld [vmem:[#allocation2 + $0x484] sm:$0xf] }
  0x87   :  { %1192 = vmatpush.bf16.msrb.mxu1 %v2237_v13  ;;  %v2310_v13 = vld [vmem:[#allocation2 + $0x4bc] sm:$0xf0] }
  0x89   :  { %1218 = vmatpush.bf16.msrb.mxu3 %v2177_v54  ;;  %v2324_v54 = vld [vmem:[#allocation2 + $0x4e0] sm:$0xf] }
  0x8a   :  { %1180 = vmatpush.bf16.msrb.mxu0 %v2165_v29  ;;  %v2689_v29 = vld [vmem:[#allocation2 + $0x52c] sm:$0xf]  ;;  %v2325_v60 = vor.u32 %v2684_v57, %v2324_v54  ;;  %v2706_v54 = vld [vmem:[#allocation2 + $0x6b0] sm:$0xf0]  ;;  %v2384_v57 = vld [vmem:[#allocation2 + $0x5e8] sm:$0xf] }
  0x8b   :  { %1193 = vmatpush.bf16.msrb.mxu1 %v2229_v20  ;;  %v2353_v32 = vor.u32 %v2689_v29, %v2350_v30  ;;  %v2385_v59 = vor.u32 %v2698_v58, %v2384_v57 }
  0x8d   :  { %1219 = vmatpush.bf16.msrb.mxu3 %v2169_v63  ;;  %v2682_v63 = vld [vmem:[#allocation2 + $0x4d0] sm:$0xf0] }
  0x8e   :  { %1225 = vmatpush.bf16.msra.mxu0 %v2289_v37  ;;  %v2341_v37 = vor.u32 %v2688_v35, %v2340_v34  ;;  %v2317_v1 = vor.u32 %v2682_v63, %v2316_v62  ;;  %v2408_v62 = vld [vmem:[#allocation2 + $0x678] sm:$0xf]  ;;  %v2704_v63 = vld [vmem:[#allocation2 + $0x680] sm:$0xf0] }
  0x8f   :  { %1238 = vmatpush.bf16.msra.mxu1 %v2353_v32 }
  0x90   :  { %1200 = vmatpush.bf16.msrb.mxu2 %v2341_v37 }
  0x92   :  { %1226 = vmatpush.bf16.msra.mxu0 %v2281_v46  ;;  %v2685_v46 = vld [vmem:[#allocation2 + $0x4fc] sm:$0xf] }
  0x93   :  { %1239 = vmatpush.bf16.msra.mxu1 %v2345_v43  ;;  %v2337_v53 = vor.u32 %v2685_v46, %v2334_v48 }
  0x94   :  { %1201 = vmatpush.bf16.msrb.mxu2 %v2333_v52 }
  0x96   :  { %1227 = vmatpush.bf16.msra.mxu0 %v2273_v55 }
  0x97   :  { %1240 = vmatpush.bf16.msra.mxu1 %v2337_v53  ;;  %v2416_v53 = vld [vmem:[#allocation2 + $0x6a8] sm:$0xf] }
  0x98   :  { %1202 = vmatpush.bf16.msrb.mxu2 %v2325_v60  ;;  %v2417_v3 = vor.u32 %v2706_v54, %v2416_v53  ;;  %v924_v54 = vld [vmem:[#allocation4 + $0x3] sm:$0x3] }
  0x9a   :  { %1228 = vmatpush.bf16.msra.mxu0 %v2265_v0  ;;  %v2681_v0 = vld [vmem:[#allocation2 + $0x4cc] sm:$0xf]  ;;  %1400 = vmatpush.bf16.msra.mxu3 %v2417_v3 }
  0x9b   :  { %1241 = vmatpush.bf16.msra.mxu1 %v2329_v61  ;;  %v2321_v5 = vor.u32 %v2681_v0, %v2318_v2  ;;  %v2380_v0 = vld [vmem:[#allocation2 + $0x5d0] sm:$0xf]  ;;  %v2697_v2 = vld [vmem:[#allocation2 + $0x5d8] sm:$0xf0]  ;;  %v2711_v3 = vld [vmem:[#allocation2 + $0x728] sm:$0xf0] }
  0x9c   :  { %1203 = vmatpush.bf16.msrb.mxu2 %v2317_v1  ;;  %v2409_v1 = vor.u32 %v2704_v63, %v2408_v62 }
  0x9e   :  { %1229 = vmatpush.bf16.msra.mxu0 %v2257_v7  ;;  %v2680_v7 = vld [vmem:[#allocation2 + $0x4b8] sm:$0xf0] }
  0x9f   :  { %1242 = vmatpush.bf16.msra.mxu1 %v2321_v5  ;;  %v2309_v12 = vor.u32 %v2680_v7, %v2308_v6  ;;  %v2703_v5 = vld [vmem:[#allocation2 + $0x668] sm:$0xf0]  ;;  %v2381_v6 = vor.u32 %v2697_v2, %v2380_v0  ;;  %v2376_v7 = vld [vmem:[#allocation2 + $0x5b8] sm:$0xf] }
  0xa1   :  { %1204 = vmatpush.bf16.msrb.mxu2 %v2309_v12 }
  0xa2   :  { %1230 = vmatpush.bf16.msra.mxu0 %v2249_v15 }
  0xa6   :  { %1231 = vmatpush.bf16.msra.mxu0 %v2241_v31  ;;  %v2294_v31 = vld [vmem:[#allocation2 + $0x48c] sm:$0xf0] }
  0xaa   :  { %1232 = vmatpush.bf16.msra.mxu0 %v2233_v42 }
  0xae   :  { %v726_v16 = vpop.f32.mrf.mxu0 }
  0xaf   :  { %v727_v17 = vadd.f32 %v726_v16, %v199_v8  ;;  %v739_v25 = vpop.f32.mrf.mxu1  ;;  %v2679_v8 = vld [vmem:[#allocation2 + $0x4b4] sm:$0xf] }
  0xb0   :  { %v2313_v15 = vor.u32 %v2679_v8, %v2310_v13  ;;  %v2696_v8 = vld [vmem:[#allocation2 + $0x5c0] sm:$0xf0]  ;;  %v2400_v13 = vld [vmem:[#allocation2 + $0x648] sm:$0xf] }
  0xb1   :  { %v740_v23 = vadd.f32 %v739_v25, %v727_v17  ;;  %v2300_v17 = vld [vmem:[#allocation2 + $0x498] sm:$0xf]  ;;  %v2678_v25 = vld [vmem:[#allocation2 + $0x4a0] sm:$0xf0]  ;;  %v2377_v12 = vor.u32 %v2696_v8, %v2376_v7 }
  0xb2   :  { %v752_v19 = vpop.f32.mrf.mxu2  ;;  %1243 = vmatpush.bf16.msra.mxu1 %v2313_v15  ;;  %v2301_v18 = vor.u32 %v2678_v25, %v2300_v17  ;;  %v2695_v15 = vld [vmem:[#allocation2 + $0x5a8] sm:$0xf0] }
  0xb3   :  { %v765_v26 = vpop.f32.mrf.mxu3  ;;  %v753_v33 = vadd.f32 %v752_v19, %v740_v23  ;;  %v2302_v19 = vld [vmem:[#allocation2 + $0x4a4] sm:$0xf0]  ;;  %v2292_v23 = vld [vmem:[#allocation2 + $0x480] sm:$0xf] }
  0xb4   :  { %v2305_v10 = vor.u32 %v2677_v9, %v2302_v19  ;;  %1205 = vmatpush.bf16.msrb.mxu2 %v2301_v18  ;;  %v2396_v18 = vld [vmem:[#allocation2 + $0x630] sm:$0xf]  ;;  %v2701_v19 = vld [vmem:[#allocation2 + $0x638] sm:$0xf0] }
  0xb5   :  { %v766_v41 = vadd.f32 %v765_v26, %v753_v33  ;;  %v2676_v26 = vld [vmem:[#allocation2 + $0x488] sm:$0xf0]  ;;  %v2297_v33 = vor.u32 %v2675_v27, %v2294_v31  ;;  %v2700_v27 = vld [vmem:[#allocation2 + $0x620] sm:$0xf0] }
  0xb6   :  { %v728_v47 = vpop.f32.mrf.mxu0  ;;  %1244 = vmatpush.bf16.msra.mxu1 %v2305_v10  ;;  %v2293_v30 = vor.u32 %v2676_v26, %v2292_v23  ;;  %v2694_v10 = vld [vmem:[#allocation2 + $0x590] sm:$0xf0]  ;;  %v2392_v26 = vld [vmem:[#allocation2 + $0x618] sm:$0xf] }
  0xb7   :  { %v873_v49 = vmax.f32 %v766_v41, 0.0  ;;  %v741_v50 = vpop.f32.mrf.mxu1 }
  0xb8   :  { %1206 = vmatpush.bf16.msrb.mxu2 %v2293_v30  ;;  %v2693_v30 = vld [vmem:[#allocation2 + $0x578] sm:$0xf0] }
  0xb9   :  { %v925_v55 = vpack.c.bf16 %v873_v49, %v873_v49 }
  0xba   :  { %v754_v51 = vpop.f32.mrf.mxu2  ;;  %1245 = vmatpush.bf16.msra.mxu1 %v2297_v33 }
  0xbb   :  { %v767_v56 = vpop.f32.mrf.mxu3  ;;  %1181 = vmatmul.bf16.vlgmr.msrb.gmra.mxu0 %v925_v55  ;;  %1220 = vmatmul.bf16.vlgmr.msrb.gmra.mxu3 %v925_v55  ;;  %v2412_v55 = vld [vmem:[#allocation2 + $0x690] sm:$0xf] }
  0xbc   :  { %v2705_v56 = vld [vmem:[#allocation2 + $0x698] sm:$0xf0]  ;;  %1387 = vmatpush.bf16.msra.mxu2 %v2385_v59  ;;  %v929_v59 = vperm.slane %v924_v54, 0 }
  0xbd   :  { %v2413_v60 = vor.u32 %v2705_v56, %v2412_v55  ;;  %v2436_v55 = vld [vmem:[#allocation2 + $0x720] sm:$0xf]  ;;  %v930_v56 = vperm.slane %v924_v54, 1 }
  0xbe   :  { %v2437_v57 = vor.u32 %v2711_v3, %v2436_v55  ;;  %v2512_v55 = vld [vmem:[#allocation2 + $0x8e8] sm:$0xf]  ;;  %v2730_v3 = vld [vmem:[#allocation2 + $0x8f0] sm:$0xf0] }
  0xbf   :  { %1401 = vmatpush.bf16.msra.mxu3 %v2413_v60 }
  0xc0   :  { %1388 = vmatpush.bf16.msra.mxu2 %v2381_v6 }
  0xc3   :  { %1402 = vmatpush.bf16.msra.mxu3 %v2409_v1 }
  0xc4   :  { %1389 = vmatpush.bf16.msra.mxu2 %v2377_v12 }
  0xca   :  { %v778_v11 = vpop.f32.mrf.mxu0 }
  0xcb   :  { %v779_v24 = vadd.f32 %v778_v11, %v200_v4  ;;  %v791_v14 = vpop.f32.mrf.mxu1  ;;  %v2404_v4 = vld [vmem:[#allocation2 + $0x660] sm:$0xf] }
  0xcc   :  { %v2405_v11 = vor.u32 %v2703_v5, %v2404_v4 }
  0xcd   :  { %v792_v16 = vadd.f32 %v791_v14, %v779_v24  ;;  %v2702_v24 = vld [vmem:[#allocation2 + $0x650] sm:$0xf0]  ;;  %v2372_v14 = vld [vmem:[#allocation2 + $0x5a0] sm:$0xf] }
  0xce   :  { %1403 = vmatpush.bf16.msra.mxu3 %v2405_v11  ;;  %v2401_v25 = vor.u32 %v2702_v24, %v2400_v13  ;;  %v2373_v9 = vor.u32 %v2695_v15, %v2372_v14  ;;  %v2432_v13 = vld [vmem:[#allocation2 + $0x708] sm:$0xf]  ;;  %v2710_v24 = vld [vmem:[#allocation2 + $0x710] sm:$0xf0]  ;;  %v2428_v15 = vld [vmem:[#allocation2 + $0x6f0] sm:$0xf] }
  0xcf   :  { %v2433_v14 = vor.u32 %v2710_v24, %v2432_v13 }
  0xd0   :  { %1390 = vmatpush.bf16.msra.mxu2 %v2373_v9 }
  0xd2   :  { %v804_v20 = vpop.f32.mrf.mxu2  ;;  %v780_v29 = vpop.f32.mrf.mxu0  ;;  %1404 = vmatpush.bf16.msra.mxu3 %v2401_v25  ;;  %v2708_v25 = vld [vmem:[#allocation2 + $0x6e0] sm:$0xf0] }
  0xd3   :  { %v805_v21 = vadd.f32 %v804_v20, %v792_v16  ;;  %v817_v22 = vpop.f32.mrf.mxu3  ;;  %v793_v32 = vpop.f32.mrf.mxu1  ;;  %v2368_v20 = vld [vmem:[#allocation2 + $0x588] sm:$0xf]  ;;  %v2364_v29 = vld [vmem:[#allocation2 + $0x570] sm:$0xf] }
  0xd4   :  { %v2365_v31 = vor.u32 %v2693_v30, %v2364_v29  ;;  %v2720_v29 = vld [vmem:[#allocation2 + $0x800] sm:$0xf0] }
  0xd5   :  { %v818_v28 = vadd.f32 %v817_v22, %v805_v21  ;;  %v2397_v21 = vor.u32 %v2701_v19, %v2396_v18  ;;  %v2369_v22 = vor.u32 %v2694_v10, %v2368_v20  ;;  %v2420_v18 = vld [vmem:[#allocation2 + $0x6c0] sm:$0xf]  ;;  %v2707_v19 = vld [vmem:[#allocation2 + $0x6c8] sm:$0xf0]  ;;  %v2480_v10 = vld [vmem:[#allocation2 + $0x828] sm:$0xf] }
  0xd6   :  { %v2421_v20 = vor.u32 %v2707_v19, %v2420_v18  ;;  %v2484_v18 = vld [vmem:[#allocation2 + $0x840] sm:$0xf]  ;;  %v2723_v19 = vld [vmem:[#allocation2 + $0x848] sm:$0xf0] }
  0xd7   :  { %v874_v34 = vmax.f32 %v818_v28, 0.0  ;;  %1405 = vmatpush.bf16.msra.mxu3 %v2397_v21  ;;  %1391 = vmatpush.bf16.msra.mxu2 %v2369_v22  ;;  %v2393_v28 = vor.u32 %v2700_v27, %v2392_v26  ;;  %v2722_v21 = vld [vmem:[#allocation2 + $0x830] sm:$0xf0]  ;;  %v2476_v22 = vld [vmem:[#allocation2 + $0x810] sm:$0xf] }
  0xd8   :  { %v2721_v26 = vld [vmem:[#allocation2 + $0x818] sm:$0xf0] }
  0xd9   :  { %v926_v35 = vpack.c.bf16 %v874_v34, %v874_v34  ;;  %v2388_v34 = vld [vmem:[#allocation2 + $0x600] sm:$0xf]  ;;  %v2477_v27 = vor.u32 %v2721_v26, %v2476_v22  ;;  %v2540_v22 = vld [vmem:[#allocation2 + $0x990] sm:$0xf]  ;;  %v2737_v26 = vld [vmem:[#allocation2 + $0x998] sm:$0xf0] }
  0xda   :  { %v806_v36 = vpop.f32.mrf.mxu2 }
  0xdb   :  { %1194 = vmatmul.bf16.vlgmr.msrb.gmra.mxu1 %v926_v35  ;;  %1233 = vmatmul.bf16.vlgmr.msra.gmra.mxu0 %v926_v35  ;;  %v819_v37 = vpop.f32.mrf.mxu3  ;;  %v2699_v35 = vld [vmem:[#allocation2 + $0x608] sm:$0xf0] }
  0xdc   :  { %1406 = vmatpush.bf16.msra.mxu3 %v2393_v28  ;;  %1392 = vmatpush.bf16.msra.mxu2 %v2365_v31  ;;  %v2389_v36 = vor.u32 %v2699_v35, %v2388_v34  ;;  %v2360_v37 = vld [vmem:[#allocation2 + $0x558] sm:$0xf]  ;;  %v2468_v31 = vld [vmem:[#allocation2 + $0x7e0] sm:$0xf]  ;;  %v2464_v34 = vld [vmem:[#allocation2 + $0x7c8] sm:$0xf] }
  0xdd   :  { %v2472_v28 = vld [vmem:[#allocation2 + $0x7f8] sm:$0xf]  ;;  %v2718_v35 = vld [vmem:[#allocation2 + $0x7d0] sm:$0xf0] }
  0xde   :  { %v2473_v30 = vor.u32 %v2720_v29, %v2472_v28  ;;  %v2536_v28 = vld [vmem:[#allocation2 + $0x978] sm:$0xf]  ;;  %v2736_v29 = vld [vmem:[#allocation2 + $0x980] sm:$0xf0] }
  0xe0   :  { %1407 = vmatpush.bf16.msra.mxu3 %v2389_v36  ;;  %v2465_v36 = vor.u32 %v2718_v35, %v2464_v34  ;;  %v2528_v34 = vld [vmem:[#allocation2 + $0x948] sm:$0xf]  ;;  %v2734_v35 = vld [vmem:[#allocation2 + $0x950] sm:$0xf0] }
  0xea   :  { %v830_v39 = vpop.f32.mrf.mxu0 }
  0xeb   :  { %v831_v40 = vadd.f32 %v830_v39, %v201_v38  ;;  %v843_v41 = vpop.f32.mrf.mxu1  ;;  %v2692_v38 = vld [vmem:[#allocation2 + $0x560] sm:$0xf0] }
  0xec   :  { %v2361_v39 = vor.u32 %v2692_v38, %v2360_v37  ;;  %v2460_v37 = vld [vmem:[#allocation2 + $0x7b0] sm:$0xf]  ;;  %v2717_v38 = vld [vmem:[#allocation2 + $0x7b8] sm:$0xf0] }
  0xed   :  { %v844_v42 = vadd.f32 %v843_v41, %v831_v40  ;;  %v2356_v40 = vld [vmem:[#allocation2 + $0x540] sm:$0xf]  ;;  %v2691_v41 = vld [vmem:[#allocation2 + $0x548] sm:$0xf0] }
  0xee   :  { %1393 = vmatpush.bf16.msra.mxu2 %v2361_v39 }
  0xf2   :  { %v856_v43 = vpop.f32.mrf.mxu2  ;;  %v832_v46 = vpop.f32.mrf.mxu0 }
  0xf3   :  { %v857_v44 = vadd.f32 %v856_v43, %v844_v42  ;;  %v869_v45 = vpop.f32.mrf.mxu3  ;;  %v845_v47 = vpop.f32.mrf.mxu1  ;;  %v2357_v42 = vor.u32 %v2691_v41, %v2356_v40  ;;  %v2714_v46 = vld [vmem:[#allocation2 + $0x770] sm:$0xf0]  ;;  %v2461_v40 = vor.u32 %v2717_v38, %v2460_v37  ;;  %v2743_v41 = vld [vmem:[#allocation4 + $0x5] ss:$0 sm:$0xff]  ;;  %v2524_v37 = vld [vmem:[#allocation2 + $0x930] sm:$0xf] }
  0xf4   :  { %v2444_v47 = vld [vmem:[#allocation2 + $0x750] sm:$0xf]  ;;  %v2733_v38 = vld [vmem:[#allocation2 + $0x938] sm:$0xf0] }
  0xf5   :  { %v870_v48 = vadd.f32 %v869_v45, %v857_v44  ;;  %1394 = vmatpush.bf16.msra.mxu2 %v2357_v42  ;;  %v2448_v45 = vld [vmem:[#allocation2 + $0x768] sm:$0xf] }
  0xf7   :  { %v875_v49 = vmax.f32 %v870_v48, 0.0  ;;  %v2449_v48 = vor.u32 %v2714_v46, %v2448_v45 }
  0xf9   :  { %v927_v50 = vpack.c.bf16 %v875_v49, %v875_v49  ;;  %v2713_v49 = vld [vmem:[#allocation2 + $0x758] sm:$0xf0]  ;;  %1483 = vmatpush.bf16.msrb.mxu0 %v2449_v48 }
  0xfa   :  { %v858_v51 = vpop.f32.mrf.mxu2 }
  0xfb   :  { %v871_v52 = vpop.f32.mrf.mxu3  ;;  %1207 = vmatmul.bf16.vlgmr.msrb.gmra.mxu2 %v927_v50  ;;  %1246 = vmatmul.bf16.vlgmr.msra.gmra.mxu1 %v927_v50  ;;  %v2445_v50 = vor.u32 %v2713_v49, %v2444_v47  ;;  %v2440_v51 = vld [vmem:[#allocation2 + $0x738] sm:$0xf] }
  0xfc   :  { %v2712_v52 = vld [vmem:[#allocation2 + $0x740] sm:$0xf0]  ;;  %v2456_v49 = vld [vmem:[#allocation2 + $0x798] sm:$0xf] }
  0xfd   :  { %1484 = vmatpush.bf16.msrb.mxu0 %v2445_v50  ;;  %v2441_v53 = vor.u32 %v2712_v52, %v2440_v51  ;;  %v2716_v50 = vld [vmem:[#allocation2 + $0x7a0] sm:$0xf0]  ;;  %v2452_v52 = vld [vmem:[#allocation2 + $0x780] sm:$0xf] }
  0xfe   :  { %v2457_v51 = vor.u32 %v2716_v50, %v2456_v49  ;;  %v2516_v50 = vld [vmem:[#allocation2 + $0x900] sm:$0xf] }
 0x101   :  { %1485 = vmatpush.bf16.msrb.mxu0 %v2441_v53  ;;  %v2715_v53 = vld [vmem:[#allocation2 + $0x788] sm:$0xf0] }
 0x102   :  { %v2453_v54 = vor.u32 %v2715_v53, %v2452_v52  ;;  %v2746_v53 = vld [vmem:[#allocation4 + $0x8] ss:$0 sm:$0xff] }
 0x105   :  { %1486 = vmatpush.bf16.msrb.mxu0 %v2437_v57  ;;  %v2513_v57 = vor.u32 %v2730_v3, %v2512_v55 }
 0x107   :  { %1651 = vmatpush.bf16.msrb.mxu2 %v2513_v57 }
 0x109   :  { %1487 = vmatpush.bf16.msrb.mxu0 %v2433_v14 }
 0x138   :  { %v2874_v61 = vpop.f32.mrf.mxu0 }
 0x139   :  { %v1183_v63 = vadd.f32 %v2874_v61, %v929_v59  ;;  %v2424_v61 = vld [vmem:[#allocation2 + $0x6d8] sm:$0xf] }
 0x13a   :  { %v2425_v9 = vor.u32 %v2708_v25, %v2424_v61  ;;  %v2488_v61 = vld [vmem:[#allocation2 + $0x858] sm:$0xf]  ;;  %v2724_v25 = vld [vmem:[#allocation2 + $0x860] sm:$0xf0] }
 0x13e   :  { %v1221_v16 = vpop.f32.mrf.mxu3 }
 0x13f   :  { %v1222_v58 = vadd.f32 %v1221_v16, %v930_v56  ;;  %v2709_v16 = vld [vmem:[#allocation2 + $0x6f8] sm:$0xf0]  ;;  %v2508_v56 = vld [vmem:[#allocation2 + $0x8d0] sm:$0xf] }
 0x140   :  { %v1184_v17 = vpop.f32.mrf.mxu0 }
 0x141   :  { %v2429_v17 = vor.u32 %v2709_v16, %v2428_v15 }
 0x143   :  { %1488 = vmatpush.bf16.msrb.mxu0 %v2429_v17 }
 0x146   :  { %v1223_v23 = vpop.f32.mrf.mxu3 }
 0x147   :  { %1489 = vmatpush.bf16.msrb.mxu0 %v2425_v9  ;;  %v2481_v23 = vor.u32 %v2722_v21, %v2480_v10  ;;  %v2489_v9 = vor.u32 %v2724_v25, %v2488_v61  ;;  %v2544_v10 = vld [vmem:[#allocation2 + $0x9a8] sm:$0xf]  ;;  %v2738_v21 = vld [vmem:[#allocation2 + $0x9b0] sm:$0xf0] }
 0x149   :  { %1567 = vmatpush.bf16.msrb.mxu1 %v2481_v23  ;;  %v2545_v23 = vor.u32 %v2738_v21, %v2544_v10 }
 0x14b   :  { %1490 = vmatpush.bf16.msrb.mxu0 %v2421_v20  ;;  %v2485_v20 = vor.u32 %v2723_v19, %v2484_v18  ;;  %1735 = vmatpush.bf16.msrb.mxu3 %v2545_v23 }
 0x14d   :  { %1568 = vmatpush.bf16.msrb.mxu1 %v2477_v27  ;;  %v2541_v27 = vor.u32 %v2737_v26, %v2540_v22 }
 0x14f   :  { %1736 = vmatpush.bf16.msrb.mxu3 %v2541_v27 }
 0x151   :  { %1569 = vmatpush.bf16.msrb.mxu1 %v2473_v30  ;;  %v2537_v30 = vor.u32 %v2736_v29, %v2536_v28 }
 0x153   :  { %1737 = vmatpush.bf16.msrb.mxu3 %v2537_v30 }
 0x158   :  { %v1195_v32 = vpop.f32.mrf.mxu1  ;;  %v1234_v33 = vpop.f32.mrf.mxu0 }
 0x159   :  { %v1235_v60 = vadd.f32 %v1234_v33, %v1222_v58  ;;  %v1196_v2 = vadd.f32 %v1195_v32, %v1183_v63  ;;  %v2719_v32 = vld [vmem:[#allocation2 + $0x7e8] sm:$0xf0]  ;;  %v2729_v58 = vld [vmem:[#allocation2 + $0x8d8] sm:$0xf0] }
 0x15a   :  { %v2469_v33 = vor.u32 %v2719_v32, %v2468_v31  ;;  %v2509_v59 = vor.u32 %v2729_v58, %v2508_v56  ;;  %v2532_v31 = vld [vmem:[#allocation2 + $0x960] sm:$0xf]  ;;  %v2735_v32 = vld [vmem:[#allocation2 + $0x968] sm:$0xf0] }
 0x15c   :  { %1570 = vmatpush.bf16.msrb.mxu1 %v2469_v33  ;;  %1652 = vmatpush.bf16.msrb.mxu2 %v2509_v59  ;;  %v2533_v33 = vor.u32 %v2735_v32, %v2532_v31  ;;  %v2747_v59 = vld [vmem:[#allocation4 + $0x9] ss:$0 sm:$0xff] }
 0x15e   :  { %1738 = vmatpush.bf16.msrb.mxu3 %v2533_v33 }
 0x160   :  { %v1197_v43 = vpop.f32.mrf.mxu1  ;;  %v1236_v44 = vpop.f32.mrf.mxu0  ;;  %1571 = vmatpush.bf16.msrb.mxu1 %v2465_v36  ;;  %v2529_v36 = vor.u32 %v2734_v35, %v2528_v34 }
 0x162   :  { %1739 = vmatpush.bf16.msrb.mxu3 %v2529_v36 }
 0x164   :  { %1572 = vmatpush.bf16.msrb.mxu1 %v2461_v40  ;;  %v2745_v40 = vld [vmem:[#allocation4 + $0x7] ss:$0 sm:$0xff] }
 0x168   :  { %1573 = vmatpush.bf16.msrb.mxu1 %v2457_v51  ;;  %v2731_v51 = vld [vmem:[#allocation2 + $0x908] sm:$0xf0] }
 0x169   :  { %v2517_v52 = vor.u32 %v2731_v51, %v2516_v50 }
 0x16c   :  { %1574 = vmatpush.bf16.msrb.mxu1 %v2453_v54 }
 0x178   :  { %v1247_v62 = vpop.f32.mrf.mxu1 }
 0x179   :  { %v1248_v0 = vadd.f32 %v1247_v62, %v1235_v60  ;;  %v2504_v60 = vld [vmem:[#allocation2 + $0x8b8] sm:$0xf]  ;;  %v2728_v62 = vld [vmem:[#allocation2 + $0x8c0] sm:$0xf0] }
 0x17a   :  { %v2505_v63 = vor.u32 %v2728_v62, %v2504_v60 }
 0x17b   :  { %v1252_v1 = vmax.f32 %v1248_v0, 0.0  ;;  %v2500_v0 = vld [vmem:[#allocation2 + $0x8a0] sm:$0xf] }
 0x17c   :  { %1653 = vmatpush.bf16.msrb.mxu2 %v2505_v63 }
 0x17d   :  { %v1287_v4 = vpack.c.bf16 %v1252_v1, %v1252_v1  ;;  %v2727_v1 = vld [vmem:[#allocation2 + $0x8a8] sm:$0xf0] }
 0x17e   :  { %v1208_v5 = vpop.f32.mrf.mxu2 }
 0x17f   :  { %v1209_v6 = vadd.f32 %v1208_v5, %v1196_v2  ;;  %1408 = vmatmul.bf16.vlgmr.msra.gmra.mxu3 %v1287_v4  ;;  %v2501_v2 = vor.u32 %v2727_v1, %v2500_v0  ;;  %v2496_v4 = vld [vmem:[#allocation2 + $0x888] sm:$0xf]  ;;  %v2726_v5 = vld [vmem:[#allocation2 + $0x890] sm:$0xf0] }
 0x180   :  { %v1249_v7 = vpop.f32.mrf.mxu1 }
 0x181   :  { %v1251_v8 = vmax.f32 %v1209_v6, 0.0  ;;  %1654 = vmatpush.bf16.msrb.mxu2 %v2501_v2  ;;  %v2497_v6 = vor.u32 %v2726_v5, %v2496_v4  ;;  %v2492_v7 = vld [vmem:[#allocation2 + $0x870] sm:$0xf] }
 0x183   :  { %v1286_v11 = vpack.c.bf16 %v1251_v8, %v1251_v8  ;;  %v2725_v8 = vld [vmem:[#allocation2 + $0x878] sm:$0xf0] }
 0x185   :  { %1395 = vmatmul.bf16.vlgmr.msra.gmra.mxu2 %v1286_v11  ;;  %v2493_v11 = vor.u32 %v2725_v8, %v2492_v7 }
 0x186   :  { %v1210_v12 = vpop.f32.mrf.mxu2  ;;  %1655 = vmatpush.bf16.msrb.mxu2 %v2497_v6 }
 0x187   :  { %v2744_v12 = vld [vmem:[#allocation4 + $0x6] ss:$0 sm:$0xff] }
 0x18a   :  { %1656 = vmatpush.bf16.msrb.mxu2 %v2493_v11 }
 0x18e   :  { %1657 = vmatpush.bf16.msrb.mxu2 %v2489_v9 }
 0x192   :  { %1658 = vmatpush.bf16.msrb.mxu2 %v2485_v20 }
 0x202   :  { %v1409_v39 = vpop.f32.mrf.mxu3 }
 0x208   :  { %v1396_v42 = vpop.f32.mrf.mxu2 }
 0x209   :  { %v1397_v43 = vadd.f32 %v2743_v41, %v1396_v42 }
 0x20a   :  { %v1411_v44 = vpop.f32.mrf.mxu3 }
 0x20b   :  { %v1410_v45 = vadd.f32 %v1409_v39, %v1397_v43  ;;  %v2525_v39 = vor.u32 %v2733_v38, %v2524_v37 }
 0x20d   :  { %v1413_v46 = vmax.f32 %v1410_v45, 0.0  ;;  %1740 = vmatpush.bf16.msrb.mxu3 %v2525_v39 }
 0x20f   :  { %v1431_v47 = vpack.c.bf16 %v1413_v46, %v1413_v46 }
 0x210   :  { %v1398_v48 = vpop.f32.mrf.mxu2 }
 0x211   :  { %1491 = vmatmul.bf16.vlgmr.msrb.gmra.mxu0 %v1431_v47  ;;  %v2520_v47 = vld [vmem:[#allocation2 + $0x918] sm:$0xf]  ;;  %v2732_v48 = vld [vmem:[#allocation2 + $0x920] sm:$0xf0] }
 0x212   :  { %v2521_v49 = vor.u32 %v2732_v48, %v2520_v47 }
 0x214   :  { %1741 = vmatpush.bf16.msrb.mxu3 %v2521_v49 }
 0x218   :  { %1742 = vmatpush.bf16.msrb.mxu3 %v2517_v52 }
 0x28e   :  { %v1492_v13 = vpop.f32.mrf.mxu0 }
 0x28f   :  { %v1493_v24 = vadd.f32 %v2744_v12, %v1492_v13 }
 0x291   :  { %v1496_v14 = vmax.f32 %v1493_v24, 0.0 }
 0x293   :  { %v1497_v15 = vmin.f32 %v1496_v14, 6.0 }
 0x295   :  { %v1515_v16 = vpack.c.bf16 %v1497_v15, %v1497_v15 }
 0x296   :  { %v1494_v17 = vpop.f32.mrf.mxu0 }
 0x297   :  { %1575 = vmatmul.bf16.vlgmr.msrb.gmra.mxu1 %v1515_v16 }
 0x314   :  { %v1576_v41 = vpop.f32.mrf.mxu1 }
 0x315   :  { %v1577_v42 = vadd.f32 %v2745_v40, %v1576_v41 }
 0x317   :  { %v1580_v43 = vmax.f32 %v1577_v42, 0.0 }
 0x319   :  { %v1581_v44 = vmin.f32 %v1580_v43, 6.0 }
 0x31b   :  { %v1599_v45 = vpack.c.bf16 %v1581_v44, %v1581_v44 }
 0x31c   :  { %v1578_v46 = vpop.f32.mrf.mxu1 }
 0x31d   :  { %1659 = vmatmul.bf16.vlgmr.msrb.gmra.mxu2 %v1599_v45 }
 0x3a0   :  { %v1660_v54 = vpop.f32.mrf.mxu2 }
 0x3a1   :  { %v1661_v55 = vadd.f32 %v2746_v53, %v1660_v54 }
 0x3a3   :  { %v1664_v3 = vmax.f32 %v1661_v55, 0.0 }
 0x3a5   :  { %v1665_v56 = vmin.f32 %v1664_v3, 6.0 }
 0x3a7   :  { %v1683_v57 = vpack.c.bf16 %v1665_v56, %v1665_v56 }
 0x3a8   :  { %v1662_v58 = vpop.f32.mrf.mxu2 }
 0x3a9   :  { %1743 = vmatmul.bf16.vlgmr.msrb.gmra.mxu3 %v1683_v57 }
 0x42c   :  { %v1744_v60 = vpop.f32.mrf.mxu3 }
 0x42d   :  { %v1745_v62 = vadd.f32 %v2747_v59, %v1744_v60 }
 0x42f   :  { %v2546_v63 = vmul.f32 -1.442695, %v1745_v62 }
 0x431   :  { %2748 = vpow2.f32 %v2546_v63 }
 0x434   :  { %v1746_v0 = vpop.f32.mrf.mxu3 }
 0x437   :  { %v2749_v1 = vpop.eup %2748 }
 0x438   :  { %v1751_v2 = vadd.f32 1.0, %v2749_v1 }
 0x43a   :  { %2750 = vrcp.f32 %v1751_v2  ;;  %v1763_v7 = vand.u32 2147483648, %v1751_v2  ;;  %v1761_v11 = vand.u32 2147483647, %v1751_v2  ;;  %vm1757_vm2 = vweird.f32 %v1751_v2 }
 0x43c   :  { %v1764_v13 = vor.u32 1.1754944e-38, %v1763_v7  ;;  %vm1762_vm5 = vcmp.eq.f32.partialorder %v1761_v11, 8.507059e+37 }
 0x440   :  { %v2751_v4 = vpop.eup %2750 }
 0x441   :  { %v1753_v5 = vmul.f32 %v2751_v4, %v1751_v2  ;;  %vm1758_vm1 = vweird.f32 %v2751_v4 }
 0x442   :  { %vm1759_vm3 = vmor %vm1757_vm2, %vm1758_vm1 }
 0x443   :  { %v1754_v6 = vsub.f32 1.0, %v1753_v5 }
 0x445   :  { %v1755_v8 = vmul.f32 %v2751_v4, %v1754_v6 }
 0x447   :  { %v1756_v12 = vadd.f32 %v2751_v4, %v1755_v8 }
 0x449   :  { %v1760_v24 = vsel %vm1759_vm3, %v2751_v4, %v1756_v12 }
 0x44a   :  { %v1765_v14 = vsel %vm1762_vm5, %v1764_v13, %v1760_v24 }
 0x44b   :  { %1768 = vst.msk [vmem:[%s2883_s3] sm:$0xff] %vm1767_vm4, %v1765_v14 }
 0x44c   :  { %1773 = vsyncpa [#allocation3], 1 }
 0x44d   :  { %1774 = vsyncpa [#allocation5], 1 }

</bundles_post_ra>
